<compile_context>
chip_gen: v6e
topology: v6e:2x2x1
jax: 0.10.0
libtpu: 0.0.40
codegen_flags: <defaults>
</compile_context>

<pallas_src>
import jax
import jax.numpy as jnp
from jax import lax
from jax.experimental import pallas as pl
from jax.experimental.pallas import tpu as pltpu

# ---- synthetic config dims ----
B, CIN, T, H, W = 2, 3, 4, 16, 16        # simulations: (B, C, T, X1, X2)
K = 3                                     # conv kernel (3x3, pad=1 -> same size)
COUT = 8                                  # frame_encoder.out_channels
P = 4                                     # config['pool_size']
VID_FEAT = P * P * COUT                   # pool_size**2 * out_channels = 128
L = 8                                     # question length
VOCAB = 50                                # config['input_size'] -> vocab_size
HID = 32                                  # tvqa hidden size
OUT = 5                                   # config['output_size']
BT = B * T                                # 8 frames total
WC = W * CIN                              # 48 input lanes, index = w*CIN + ci
WO = W * COUT                             # 128 conv-output lanes, index = w*COUT + co
PC = P * COUT                             # 32 pooled lanes, index = pw*COUT + co


# --------------------------------------------------------------------------
# Fused kernel: conv+ReLU (3 banded matmuls) -> adaptive pool (2 matmuls)
#               -> ABC head (masked mean, projection, attention, classifier)
# --------------------------------------------------------------------------
def _tvqa_fused_kernel(frames_ref, wconv_ref, bconv_ref, sw_ref, sh_ref,
                       qe_ref, qm_ref, wv_ref, bv_ref, wo_ref, bo_ref,
                       out_ref, xpad_ref):
    # ---- frame_encoder: Conv2d(3x3, pad=1) + ReLU, all BT frames at once ----
    # halo rows handled in a VMEM scratch (no XLA pad op, no padded HBM copy)
    zrow = jnp.zeros((BT, 1, WC), jnp.float32)
    xpad_ref[:, 0:1, :] = zrow
    xpad_ref[:, H + 1:H + 2, :] = zrow
    xpad_ref[:, 1:H + 1, :] = frames_ref[...]

    acc = jnp.zeros((BT * H, WO), jnp.float32)
    for dh in range(K):                                        # 3 MXU matmuls, no im2col
        xs = xpad_ref[:, dh:dh + H, :].reshape(BT * H, WC)     # (128, 48)
        acc = acc + jnp.dot(xs, wconv_ref[dh],                 # banded (48, 128) weights
                            preferred_element_type=jnp.float32)
    z = jnp.maximum(acc + bconv_ref[...], 0.0)                 # (BT*H, W*COUT) = (128, 128)

    # ---- AdaptiveAvgPool2d(P): W-pool (right matmul) then H-pool (left matmul) ----
    zw = jnp.dot(z, sw_ref[...], preferred_element_type=jnp.float32)       # (BT*H, PC)
    pooled = jnp.dot(sh_ref[...], zw, preferred_element_type=jnp.float32)  # (P*BT, PC), rows=(ph,n)
    # lane-dense (BT, 128) visual slab in (ph, pw, c) feature order; w_v rows are
    # pre-permuted in the wrapper so this matches torch's nn.Flatten (c, ph, pw) order.
    visual = jnp.concatenate(
        [pooled[i * BT:(i + 1) * BT, :] for i in range(P)], axis=-1)       # (BT, 128)

    # ---- ABC head ----
    qe = qe_ref[...]                                           # (B, L, HID)
    m = qm_ref[...]                                            # (B, L)
    denom = jnp.maximum(jnp.sum(m, axis=1, keepdims=True), 1.0)   # guard length == 0
    q = jnp.sum(qe * m[:, :, None], axis=1) / denom            # (B, HID)

    v = jnp.dot(visual, wv_ref[...], preferred_element_type=jnp.float32)
    v = jnp.maximum(v + bv_ref[...], 0.0)                      # (BT, HID)
    v3 = v.reshape(B, T, HID)

    # question -> video attention over T (visual_lengths == T, no masking needed)
    s = jnp.sum(v3 * q[:, None, :], axis=-1)                   # (B, T)
    s = s - jnp.max(s, axis=-1, keepdims=True)
    e = jnp.exp(s)
    a = e / jnp.sum(e, axis=-1, keepdims=True)
    ctx = jnp.sum(v3 * a[:, :, None], axis=1)                  # (B, HID)

    feat = jnp.concatenate([q, ctx], axis=-1)                  # (B, 2*HID)
    out_ref[...] = jnp.dot(feat, wo_ref[...],
                           preferred_element_type=jnp.float32) + bo_ref[...]


# --------------------------------------------------------------------------
# Parameter-only prep (tiny; folded into the jit, hoistable once in a real model)
# --------------------------------------------------------------------------
def _conv_band_mats(w_conv):
    """torch conv weight (COUT, CIN, K, K) -> K banded (W*CIN, W*COUT) matrices, one per kh."""
    jj = jnp.arange(W)                          # input column j
    ww = jnp.arange(W)                          # output column w
    kw = jj[:, None] - ww[None, :] + 1          # tap index; borders (pad) fall outside [0, K)
    valid = (kw >= 0) & (kw < K)
    kw_c = jnp.clip(kw, 0, K - 1)
    wt = jnp.transpose(w_conv, (2, 3, 1, 0))    # (kh, kw, ci, co)
    mats = []
    for dh in range(K):
        mm = jnp.where(valid[:, :, None, None], wt[dh][kw_c], 0.0)   # (W, W, CIN, COUT)
        mats.append(jnp.transpose(mm, (0, 2, 1, 3)).reshape(WC, WO)) # [(j,ci), (w,co)]
    return jnp.stack(mats)                      # (K, 48, 128)


def _pool_mats():
    """Exact AdaptiveAvgPool2d(P) on HxW (divisible) as right (W) / left (H) pooling matmuls."""
    rw, rc = jnp.arange(WO) // COUT, jnp.arange(WO) % COUT
    cpw, cc = jnp.arange(PC) // COUT, jnp.arange(PC) % COUT
    sw = ((rw[:, None] // (W // P) == cpw[None, :]) &
          (rc[:, None] == cc[None, :])).astype(jnp.float32) / (W // P)          # (128, 32)
    rph, rn = jnp.arange(P * BT) // BT, jnp.arange(P * BT) % BT
    cn, ch = jnp.arange(BT * H) // H, jnp.arange(BT * H) % H
    sh = ((rn[:, None] == cn[None, :]) &
          (rph[:, None] == ch[None, :] // (H // P))).astype(jnp.float32) / (H // P)  # (32, 128)
    return sw, sh


def _wv_permuted(w_v):
    """Reorder w_v rows from torch (c, ph, pw) flatten order to the kernel's (ph, pw, c) order."""
    fk = jnp.arange(VID_FEAT)
    ph, pw, c = fk // (P * COUT), (fk // COUT) % P, fk % COUT
    return w_v[c * (P * P) + ph * P + pw, :]


# --------------------------------------------------------------------------
# Full forward (mirrors TVQA.forward / process_simulation)
# --------------------------------------------------------------------------
def tvqa_forward(params, simulations, questions, lengths):
    Bn, C, Tn, X1, X2 = simulations.shape
    assert (Bn, C, Tn, X1, X2) == (B, CIN, T, H, W) and H % P == 0 and W % P == 0
    # (B, C, T, H, W) -> (B*T, H, W*C): one transpose (same count as torch's permute), no pad.
    frames = jnp.transpose(simulations, (0, 2, 3, 4, 1)).reshape(Bn * Tn, X1, X2 * C)
    q_emb = jnp.take(params["embed"], questions, axis=0)         # (B, L, HID)
    q_mask = (jnp.arange(L)[None, :] < lengths[:, None]).astype(jnp.float32)

    w_mats = _conv_band_mats(params["w_conv"])
    b_row = jnp.tile(params["b_conv"], W).reshape(1, WO)
    sw, sh = _pool_mats()
    w_v = _wv_permuted(params["w_v"])

    return pl.pallas_call(
        _tvqa_fused_kernel,
        out_shape=jax.ShapeDtypeStruct((B, OUT), jnp.float32),
        scratch_shapes=[pltpu.VMEM((BT, H + 2, WC), jnp.float32)],
    )(frames, w_mats, b_row, sw, sh, q_emb, q_mask,
      w_v, params["b_v"], params["w_o"], params["b_o"])


# --------------------------------------------------------------------------
# Pure-JAX reference (same semantics) for a numerical self-check
# --------------------------------------------------------------------------
def tvqa_reference(params, simulations, questions, lengths):
    Bn, C, Tn, X1, X2 = simulations.shape
    frames = jnp.transpose(simulations, (0, 2, 1, 3, 4)).reshape(Bn * Tn, C, X1, X2)
    y = lax.conv_general_dilated(frames, params["w_conv"], (1, 1), ((1, 1), (1, 1)),
                                 dimension_numbers=("NCHW", "OIHW", "NCHW"))
    y = jnp.maximum(y + params["b_conv"][None, :, None, None], 0.0)
    y = y.reshape(Bn * Tn, COUT, P, H // P, P, W // P).mean(axis=(3, 5))
    visual = y.reshape(Bn * Tn, VID_FEAT)
    q_emb = params["embed"][questions]
    m = (jnp.arange(L)[None, :] < lengths[:, None]).astype(jnp.float32)
    q = (q_emb * m[:, :, None]).sum(1) / jnp.maximum(m.sum(1, keepdims=True), 1.0)
    v = jnp.maximum(visual @ params["w_v"] + params["b_v"], 0.0).reshape(Bn, Tn, HID)
    a = jax.nn.softmax((v * q[:, None, :]).sum(-1), axis=-1)
    ctx = (v * a[:, :, None]).sum(1)
    feat = jnp.concatenate([q, ctx], axis=-1)
    return feat @ params["w_o"] + params["b_o"]


if __name__ == "__main__":
    key = jax.random.PRNGKey(0)
    ks = jax.random.split(key, 10)
    params = {
        "w_conv": jax.random.normal(ks[0], (COUT, CIN, K, K), jnp.float32) * 0.1,
        "b_conv": jax.random.normal(ks[1], (COUT,), jnp.float32) * 0.01,
        "embed":  jax.random.normal(ks[2], (VOCAB, HID), jnp.float32) * 0.1,
        "w_v":    jax.random.normal(ks[3], (VID_FEAT, HID), jnp.float32) * 0.1,
        "b_v":    jax.random.normal(ks[4], (1, HID), jnp.float32) * 0.01,
        "w_o":    jax.random.normal(ks[5], (2 * HID, OUT), jnp.float32) * 0.1,
        "b_o":    jax.random.normal(ks[6], (1, OUT), jnp.float32) * 0.01,
    }
    simulations = jax.random.normal(ks[7], (B, CIN, T, H, W), jnp.float32)
    questions = jax.random.randint(ks[8], (B, L), 0, VOCAB, dtype=jnp.int32)
    lengths = jnp.array([L, L - 3], dtype=jnp.int32)

    logits = jax.jit(tvqa_forward)(params, simulations, questions, lengths)
    jax.block_until_ready(logits)
    assert logits.shape == (B, OUT) and logits.dtype == jnp.float32

    ref = tvqa_reference(params, simulations, questions, lengths)
    assert jnp.allclose(logits, ref, rtol=2e-2, atol=2e-2), (logits, ref)
    print("KERNEL_OK")
</pallas_src>

<mosaic_0001>
module attributes {stable_mosaic.version = 11 : i64} {
  func.func @_tvqa_fused_kernel(%arg0: memref<8x16x48xf32, #tpu.memory_space<vmem>>, %arg1: memref<3x48x128xf32, #tpu.memory_space<vmem>>, %arg2: memref<1x128xf32, #tpu.memory_space<vmem>>, %arg3: memref<128x32xf32, #tpu.memory_space<vmem>>, %arg4: memref<32x128xf32, #tpu.memory_space<vmem>>, %arg5: memref<2x8x32xf32, #tpu.memory_space<vmem>>, %arg6: memref<2x8xf32, #tpu.memory_space<vmem>>, %arg7: memref<128x32xf32, #tpu.memory_space<vmem>>, %arg8: memref<1x32xf32, #tpu.memory_space<vmem>>, %arg9: memref<64x5xf32, #tpu.memory_space<vmem>>, %arg10: memref<1x5xf32, #tpu.memory_space<vmem>>, %arg11: memref<2x5xf32, #tpu.memory_space<vmem>>, %arg12: memref<8x18x48xf32, #tpu.memory_space<vmem>>) attributes {dimension_semantics = [], scalar_prefetch = 0 : i64, scratch_operands = 1 : i64, tpu.core_type = #tpu.core_type<tc>} {
    %cst = arith.constant 0.000000e+00 : f32
    %0 = vector.broadcast %cst : f32 to vector<8x1x48xf32>
    %c0 = arith.constant 0 : index
    %c0_0 = arith.constant 0 : index
    %c0_1 = arith.constant 0 : index
    %1 = vector.load %arg12[%c0, %c0_0, %c0_1] : memref<8x18x48xf32, #tpu.memory_space<vmem>>, vector<8x1x48xf32>
    tpu.vector_store %arg12[%c0, %c0_0, %c0_1], %0 {strides = array<i32>} : memref<8x18x48xf32, #tpu.memory_space<vmem>>, vector<8x1x48xf32>,
    %c0_2 = arith.constant 0 : index
    %c17 = arith.constant 17 : index
    %c0_3 = arith.constant 0 : index
    %2 = vector.load %arg12[%c0_2, %c17, %c0_3] : memref<8x18x48xf32, #tpu.memory_space<vmem>>, vector<8x1x48xf32>
    tpu.vector_store %arg12[%c0_2, %c17, %c0_3], %0 {strides = array<i32>} : memref<8x18x48xf32, #tpu.memory_space<vmem>>, vector<8x1x48xf32>,
    %c0_4 = arith.constant 0 : index
    %c0_5 = arith.constant 0 : index
    %c0_6 = arith.constant 0 : index
    %3 = vector.load %arg0[%c0_4, %c0_5, %c0_6] : memref<8x16x48xf32, #tpu.memory_space<vmem>>, vector<8x16x48xf32>
    %c0_7 = arith.constant 0 : index
    %c1 = arith.constant 1 : index
    %c0_8 = arith.constant 0 : index
    %4 = vector.load %arg12[%c0_7, %c1, %c0_8] : memref<8x18x48xf32, #tpu.memory_space<vmem>>, vector<8x16x48xf32>
    tpu.vector_store %arg12[%c0_7, %c1, %c0_8], %3 {strides = array<i32>} : memref<8x18x48xf32, #tpu.memory_space<vmem>>, vector<8x16x48xf32>,
    %cst_9 = arith.constant 0.000000e+00 : f32
    %5 = vector.broadcast %cst_9 : f32 to vector<128x128xf32>
    %c0_10 = arith.constant 0 : index
    %c0_11 = arith.constant 0 : index
    %c0_12 = arith.constant 0 : index
    %6 = vector.load %arg12[%c0_10, %c0_11, %c0_12] : memref<8x18x48xf32, #tpu.memory_space<vmem>>, vector<8x16x48xf32>
    %7 = vector.shape_cast %6 : vector<8x16x48xf32> to vector<128x48xf32>
    %c0_13 = arith.constant 0 : index
    %c0_14 = arith.constant 0 : index
    %c0_15 = arith.constant 0 : index
    %8 = vector.load %arg1[%c0_13, %c0_14, %c0_15] : memref<3x48x128xf32, #tpu.memory_space<vmem>>, vector<1x48x128xf32>
    %9 = vector.shape_cast %8 : vector<1x48x128xf32> to vector<48x128xf32>
    %cst_16 = arith.constant dense<0.000000e+00> : vector<128x128xf32>
    %10 = tpu.matmul %7, %9, %cst_16 {dimension_numbers = #tpu.dot_dimension_numbers<[1], [0], [0], [1], [0, 0, 1, 1], [], []>} : vector<128x48xf32>, vector<48x128xf32>, vector<128x128xf32> -> vector<128x128xf32>
    %11 = arith.addf %5, %10 : vector<128x128xf32>
    %c0_17 = arith.constant 0 : index
    %c1_18 = arith.constant 1 : index
    %c0_19 = arith.constant 0 : index
    %12 = vector.load %arg12[%c0_17, %c1_18, %c0_19] : memref<8x18x48xf32, #tpu.memory_space<vmem>>, vector<8x16x48xf32>
    %13 = vector.shape_cast %12 : vector<8x16x48xf32> to vector<128x48xf32>
    %c1_20 = arith.constant 1 : index
    %c0_21 = arith.constant 0 : index
    %c0_22 = arith.constant 0 : index
    %14 = vector.load %arg1[%c1_20, %c0_21, %c0_22] : memref<3x48x128xf32, #tpu.memory_space<vmem>>, vector<1x48x128xf32>
    %15 = vector.shape_cast %14 : vector<1x48x128xf32> to vector<48x128xf32>
    %cst_23 = arith.constant dense<0.000000e+00> : vector<128x128xf32>
    %16 = tpu.matmul %13, %15, %cst_23 {dimension_numbers = #tpu.dot_dimension_numbers<[1], [0], [0], [1], [0, 0, 1, 1], [], []>} : vector<128x48xf32>, vector<48x128xf32>, vector<128x128xf32> -> vector<128x128xf32>
    %17 = arith.addf %11, %16 : vector<128x128xf32>
    %c0_24 = arith.constant 0 : index
    %c2 = arith.constant 2 : index
    %c0_25 = arith.constant 0 : index
    %18 = vector.load %arg12[%c0_24, %c2, %c0_25] : memref<8x18x48xf32, #tpu.memory_space<vmem>>, vector<8x16x48xf32>
    %19 = vector.shape_cast %18 : vector<8x16x48xf32> to vector<128x48xf32>
    %c2_26 = arith.constant 2 : index
    %c0_27 = arith.constant 0 : index
    %c0_28 = arith.constant 0 : index
    %20 = vector.load %arg1[%c2_26, %c0_27, %c0_28] : memref<3x48x128xf32, #tpu.memory_space<vmem>>, vector<1x48x128xf32>
    %21 = vector.shape_cast %20 : vector<1x48x128xf32> to vector<48x128xf32>
    %cst_29 = arith.constant dense<0.000000e+00> : vector<128x128xf32>
    %22 = tpu.matmul %19, %21, %cst_29 {dimension_numbers = #tpu.dot_dimension_numbers<[1], [0], [0], [1], [0, 0, 1, 1], [], []>} : vector<128x48xf32>, vector<48x128xf32>, vector<128x128xf32> -> vector<128x128xf32>
    %23 = arith.addf %17, %22 : vector<128x128xf32>
    %c0_30 = arith.constant 0 : index
    %c0_31 = arith.constant 0 : index
    %24 = vector.load %arg2[%c0_30, %c0_31] : memref<1x128xf32, #tpu.memory_space<vmem>>, vector<1x128xf32>
    %25 = vector.broadcast %24 : vector<1x128xf32> to vector<128x128xf32>
    %26 = arith.addf %23, %25 : vector<128x128xf32>
    %cst_32 = arith.constant 0.000000e+00 : f32
    %27 = vector.broadcast %cst_32 : f32 to vector<128x128xf32>
    %28 = arith.maximumf %26, %27 : vector<128x128xf32>
    %c0_33 = arith.constant 0 : index
    %c0_34 = arith.constant 0 : index
    %29 = vector.load %arg3[%c0_33, %c0_34] : memref<128x32xf32, #tpu.memory_space<vmem>>, vector<128x32xf32>
    %cst_35 = arith.constant dense<0.000000e+00> : vector<128x32xf32>
    %30 = tpu.matmul %28, %29, %cst_35 {dimension_numbers = #tpu.dot_dimension_numbers<[1], [0], [0], [1], [0, 0, 1, 1], [], []>} : vector<128x128xf32>, vector<128x32xf32>, vector<128x32xf32> -> vector<128x32xf32>
    %c0_36 = arith.constant 0 : index
    %c0_37 = arith.constant 0 : index
    %31 = vector.load %arg4[%c0_36, %c0_37] : memref<32x128xf32, #tpu.memory_space<vmem>>, vector<32x128xf32>
    %cst_38 = arith.constant dense<0.000000e+00> : vector<32x32xf32>
    %32 = tpu.matmul %31, %30, %cst_38 {dimension_numbers = #tpu.dot_dimension_numbers<[1], [0], [0], [1], [0, 0, 1, 1], [], []>} : vector<32x128xf32>, vector<128x32xf32>, vector<32x32xf32> -> vector<32x32xf32>
    %33 = vector.extract_strided_slice %32 {offsets = [0, 0], sizes = [8, 32], strides = [1, 1]} : vector<32x32xf32> to vector<8x32xf32>
    %34 = vector.extract_strided_slice %32 {offsets = [8, 0], sizes = [8, 32], strides = [1, 1]} : vector<32x32xf32> to vector<8x32xf32>
    %35 = vector.extract_strided_slice %32 {offsets = [16, 0], sizes = [8, 32], strides = [1, 1]} : vector<32x32xf32> to vector<8x32xf32>
    %36 = vector.extract_strided_slice %32 {offsets = [24, 0], sizes = [8, 32], strides = [1, 1]} : vector<32x32xf32> to vector<8x32xf32>
    %37 = tpu.concatenate %33, %34, %35, %36 in 1 : vector<8x32xf32>, vector<8x32xf32>, vector<8x32xf32>, vector<8x32xf32> -> vector<8x128xf32>
    %c0_39 = arith.constant 0 : index
    %c0_40 = arith.constant 0 : index
    %c0_41 = arith.constant 0 : index
    %38 = vector.load %arg5[%c0_39, %c0_40, %c0_41] : memref<2x8x32xf32, #tpu.memory_space<vmem>>, vector<2x8x32xf32>
    %c0_42 = arith.constant 0 : index
    %c0_43 = arith.constant 0 : index
    %39 = vector.load %arg6[%c0_42, %c0_43] : memref<2x8xf32, #tpu.memory_space<vmem>>, vector<2x8xf32>
    %cst_44 = arith.constant dense<0.000000e+00> : vector<2xf32>
    %40 = vector.multi_reduction <add>, %39, %cst_44 [1] : vector<2x8xf32> to vector<2xf32>
    %41 = vector.shape_cast %40 : vector<2xf32> to vector<2x1xf32>
    %cst_45 = arith.constant 1.000000e+00 : f32
    %42 = vector.broadcast %cst_45 : f32 to vector<2x1xf32>
    %43 = arith.maximumf %41, %42 : vector<2x1xf32>
    %44 = vector.shape_cast %39 : vector<2x8xf32> to vector<2x8x1xf32>
    %45 = vector.broadcast %44 : vector<2x8x1xf32> to vector<2x8x32xf32>
    %46 = arith.mulf %38, %45 : vector<2x8x32xf32>
    %cst_46 = arith.constant dense<0.000000e+00> : vector<2x32xf32>
    %47 = vector.multi_reduction <add>, %46, %cst_46 [1] : vector<2x8x32xf32> to vector<2x32xf32>
    %48 = vector.broadcast %43 : vector<2x1xf32> to vector<2x32xf32>
    %49 = arith.divf %47, %48 : vector<2x32xf32>
    %c0_47 = arith.constant 0 : index
    %c0_48 = arith.constant 0 : index
    %50 = vector.load %arg7[%c0_47, %c0_48] : memref<128x32xf32, #tpu.memory_space<vmem>>, vector<128x32xf32>
    %cst_49 = arith.constant dense<0.000000e+00> : vector<8x32xf32>
    %51 = tpu.matmul %37, %50, %cst_49 {dimension_numbers = #tpu.dot_dimension_numbers<[1], [0], [0], [1], [0, 0, 1, 1], [], []>} : vector<8x128xf32>, vector<128x32xf32>, vector<8x32xf32> -> vector<8x32xf32>
    %c0_50 = arith.constant 0 : index
    %c0_51 = arith.constant 0 : index
    %52 = vector.load %arg8[%c0_50, %c0_51] : memref<1x32xf32, #tpu.memory_space<vmem>>, vector<1x32xf32>
    %53 = vector.broadcast %52 : vector<1x32xf32> to vector<8x32xf32>
    %54 = arith.addf %51, %53 : vector<8x32xf32>
    %cst_52 = arith.constant 0.000000e+00 : f32
    %55 = vector.broadcast %cst_52 : f32 to vector<8x32xf32>
    %56 = arith.maximumf %54, %55 : vector<8x32xf32>
    %57 = vector.shape_cast %56 : vector<8x32xf32> to vector<2x4x32xf32>
    %58 = vector.shape_cast %49 : vector<2x32xf32> to vector<2x1x32xf32>
    %59 = vector.broadcast %58 : vector<2x1x32xf32> to vector<2x4x32xf32>
    %60 = arith.mulf %57, %59 : vector<2x4x32xf32>
    %cst_53 = arith.constant dense<0.000000e+00> : vector<2x4xf32>
    %61 = vector.multi_reduction <add>, %60, %cst_53 [2] : vector<2x4x32xf32> to vector<2x4xf32>
    %cst_54 = arith.constant dense<0xFF800000> : vector<2xf32>
    %62 = vector.multi_reduction <maximumf>, %61, %cst_54 [1] : vector<2x4xf32> to vector<2xf32>
    %63 = vector.shape_cast %62 : vector<2xf32> to vector<2x1xf32>
    %64 = vector.broadcast %63 : vector<2x1xf32> to vector<2x4xf32>
    %65 = arith.subf %61, %64 : vector<2x4xf32>
    %66 = math.exp %65 : vector<2x4xf32>
    %cst_55 = arith.constant dense<0.000000e+00> : vector<2xf32>
    %67 = vector.multi_reduction <add>, %66, %cst_55 [1] : vector<2x4xf32> to vector<2xf32>
    %68 = vector.shape_cast %67 : vector<2xf32> to vector<2x1xf32>
    %69 = vector.broadcast %68 : vector<2x1xf32> to vector<2x4xf32>
    %70 = arith.divf %66, %69 : vector<2x4xf32>
    %71 = vector.shape_cast %70 : vector<2x4xf32> to vector<2x4x1xf32>
    %72 = vector.broadcast %71 : vector<2x4x1xf32> to vector<2x4x32xf32>
    %73 = arith.mulf %57, %72 : vector<2x4x32xf32>
    %cst_56 = arith.constant dense<0.000000e+00> : vector<2x32xf32>
    %74 = vector.multi_reduction <add>, %73, %cst_56 [1] : vector<2x4x32xf32> to vector<2x32xf32>
    %75 = tpu.concatenate %49, %74 in 1 : vector<2x32xf32>, vector<2x32xf32> -> vector<2x64xf32>
    %c0_57 = arith.constant 0 : index
    %c0_58 = arith.constant 0 : index
    %76 = vector.load %arg9[%c0_57, %c0_58] : memref<64x5xf32, #tpu.memory_space<vmem>>, vector<64x5xf32>
    %cst_59 = arith.constant dense<0.000000e+00> : vector<2x5xf32>
    %77 = tpu.matmul %75, %76, %cst_59 {dimension_numbers = #tpu.dot_dimension_numbers<[1], [0], [0], [1], [0, 0, 1, 1], [], []>} : vector<2x64xf32>, vector<64x5xf32>, vector<2x5xf32> -> vector<2x5xf32>
    %c0_60 = arith.constant 0 : index
    %c0_61 = arith.constant 0 : index
    %78 = vector.load %arg10[%c0_60, %c0_61] : memref<1x5xf32, #tpu.memory_space<vmem>>, vector<1x5xf32>
    %79 = vector.broadcast %78 : vector<1x5xf32> to vector<2x5xf32>
    %80 = arith.addf %77, %79 : vector<2x5xf32>
    %c0_62 = arith.constant 0 : index
    %c0_63 = arith.constant 0 : index
    %81 = vector.load %arg11[%c0_62, %c0_63] : memref<2x5xf32, #tpu.memory_space<vmem>>, vector<2x5xf32>
    tpu.vector_store %arg11[%c0_62, %c0_63], %80 {strides = array<i32>} : memref<2x5xf32, #tpu.memory_space<vmem>>, vector<2x5xf32>,
    return
  }
}

</mosaic_0001>

<bundles_post_ra>
// kernel: tile.8
= control target key start
LH: loop header
LB: loop body
LE: loop exit
PB: predicated region body
PF: predicated region fallthrough
CT: control target
= control target key end

     0   :  { %s28_s0 = inlined_call_operand.vmem [shape: f32[8], index: 0, kind: input, shape index: {}]   ;;  %s29_s1 = inlined_call_operand.vmem [shape: f32[16,8], index: 1, kind: output, shape index: {}]  }
   0x1   :  { %v4_v0 = vld [vmem:[%s28_s0] ss:$0 sm:$0xff] }
   0x2   :  { %5 = vst [vmem:[%s29_s1] sm:$0xff] %v4_v0  ;;  %8 = vst [vmem:[%s29_s1 + $0x8] sm:$0xff] %v4_v0 }

// kernel: tile.9
= control target key start
LH: loop header
LB: loop body
LE: loop exit
PB: predicated region body
PF: predicated region fallthrough
CT: control target
= control target key end

     0   :  { %s133_s10 = smov 120   ;;  %s134_s11 = smov 104   ;;  %vm3_vm0 = vcmask 64512   ;;  %vm9_vm1 = vcmask 1048512   ;;  %vm15_vm2 = vcmask 982912   ;;  %vm21_vm3 = vcmask 917312   ;;  %s209_s0 = inlined_call_operand.vmem [shape: f32[16,8], index: 0, kind: input, shape index: {}]   ;;  %s210_s1 = inlined_call_operand.vmem [shape: f32[1,128], index: 1, kind: output, shape index: {}]  }
   0x1   :  { %v103_v0 = vld [vmem:[%s209_s0 + $0xf] sm:$0x1]   ;;  %v105_v1 = vld [vmem:[%s209_s0 + $0xd] sm:$0x1]   ;;  %v104_v2 = vld [vmem:[%s209_s0 + $0xe] sm:$0x1]  }
   0x2   :  { %7 = vrot.lane.b32.xlu0 %v103_v0, %s133_s10  ;;  %19 = vrot.lane.b32.xlu1 %v105_v1, %s134_s11  ;;  %v106_v3 = vld [vmem:[%s209_s0 + $0xc] sm:$0x1]   ;;  %s135_s16 = smov 112   ;;  %s136_s17 = smov 96   ;;  %v107_v4 = vld [vmem:[%s209_s0 + $0xb] sm:$0x1]  }
   0x3   :  { %v108_v5 = vld [vmem:[%s209_s0 + $0xa] sm:$0x1]   ;;  %v2_v6 = vld [vmem:[%s209_s0] sm:$0x1]   ;;  %s137_s24 = smov 88   ;;  %s138_s25 = smov 80  }
   0x4   :  { %4 = vst.msk [vmem:[#allocation0] sm:$0x1] %vm3_vm0, %v2_v6   ;;  %v109_v7 = vld [vmem:[%s209_s0 + $0x9] sm:$0x1]   ;;  %v110_v8 = vld [vmem:[%s209_s0 + $0x8] sm:$0x1]  }
   0x5   :  { %s139_s30 = smov 72   ;;  %s140_s2 = smov 64   ;;  %v111_v9 = vld [vmem:[%s209_s0 + $0x7] sm:$0x1]   ;;  %v112_v10 = vld [vmem:[%s209_s0 + $0x6] sm:$0x1]  }
   0x6   :  { %13 = vrot.lane.b32.xlu0 %v104_v2, %s135_s16  ;;  %25 = vrot.lane.b32.xlu1 %v106_v3, %s136_s17  ;;  %s141_s7 = smov 56   ;;  %s142_s8 = smov 48   ;;  %v113_v11 = vld [vmem:[%s209_s0 + $0x5] sm:$0x1]   ;;  %v114_v12 = vld [vmem:[%s209_s0 + $0x4] sm:$0x1]  }
   0x7   :  { %s143_s13 = smov 40   ;;  %s144_s14 = smov 32   ;;  %v115_v13 = vld [vmem:[%s209_s0 + $0x3] sm:$0x1]   ;;  %v116_v14 = vld [vmem:[%s209_s0 + $0x2] sm:$0x1]  }
   0x8   :  { %s145_s19 = smov 24   ;;  %s146_s20 = smov 16   ;;  %v117_v15 = vld [vmem:[%s209_s0 + $0x1] sm:$0x1]   ;;  %vm27_vm4 = vcmask 851712   ;;  %vm33_vm5 = vcmask 786112  }
   0x9   :  { %s147_s0 = smov 8   ;;  %vm39_vm6 = vcmask 720512   ;;  %vm45_vm7 = vcmask 654912   ;;  %vm51_vm8 = vcmask 589312   ;;  %vm57_vm9 = vcmask 523712  }
   0xa   :  { %31 = vrot.lane.b32.xlu0 %v107_v4, %s137_s24  ;;  %37 = vrot.lane.b32.xlu1 %v108_v5, %s138_s25  ;;  %vm63_vm10 = vcmask 458112   ;;  %vm69_vm11 = vcmask 392512   ;;  %vm75_vm12 = vcmask 326912   ;;  %vm81_vm13 = vcmask 261312  }
   0xb   :  { %vm87_vm14 = vcmask 195712   ;;  %vm93_vm15 = vcmask 130112  }
   0xe   :  { %43 = vrot.lane.b32.xlu0 %v109_v7, %s139_s30  ;;  %49 = vrot.lane.b32.xlu1 %v110_v8, %s140_s2 }
  0x12   :  { %55 = vrot.lane.b32.xlu0 %v111_v9, %s141_s7  ;;  %61 = vrot.lane.b32.xlu1 %v112_v10, %s142_s8 }
  0x16   :  { %67 = vrot.lane.b32.xlu0 %v113_v11, %s143_s13  ;;  %73 = vrot.lane.b32.xlu1 %v114_v12, %s144_s14 }
  0x1a   :  { %79 = vrot.lane.b32.xlu0 %v115_v13, %s145_s19  ;;  %85 = vrot.lane.b32.xlu1 %v116_v14, %s146_s20 }
  0x1e   :  { %91 = vrot.lane.b32.xlu0 %v117_v15, %s147_s0 }
  0x74   :  { %v8_v16 = vpop.permute.xlu0 %7   ;;  %v20_v17 = vpop.permute.xlu1 %19  }
  0x75   :  { %10 = vst.msk [vmem:[#allocation0] sm:$0x1] %vm9_vm1, %v8_v16  }
  0x78   :  { %v14_v18 = vpop.permute.xlu0 %13   ;;  %v26_v19 = vpop.permute.xlu1 %25  }
  0x79   :  { %16 = vst.msk [vmem:[#allocation0] sm:$0x1] %vm15_vm2, %v14_v18  }
  0x7a   :  { %22 = vst.msk [vmem:[#allocation0] sm:$0x1] %vm21_vm3, %v20_v17  }
  0x7b   :  { %28 = vst.msk [vmem:[#allocation0] sm:$0x1] %vm27_vm4, %v26_v19  }
  0x7c   :  { %v32_v20 = vpop.permute.xlu0 %31   ;;  %v38_v21 = vpop.permute.xlu1 %37  }
  0x7d   :  { %34 = vst.msk [vmem:[#allocation0] sm:$0x1] %vm33_vm5, %v32_v20  }
  0x7e   :  { %40 = vst.msk [vmem:[#allocation0] sm:$0x1] %vm39_vm6, %v38_v21  }
  0x80   :  { %v44_v22 = vpop.permute.xlu0 %43   ;;  %v50_v23 = vpop.permute.xlu1 %49  }
  0x81   :  { %46 = vst.msk [vmem:[#allocation0] sm:$0x1] %vm45_vm7, %v44_v22  }
  0x82   :  { %52 = vst.msk [vmem:[#allocation0] sm:$0x1] %vm51_vm8, %v50_v23  }
  0x84   :  { %v56_v24 = vpop.permute.xlu0 %55   ;;  %v62_v25 = vpop.permute.xlu1 %61  }
  0x85   :  { %58 = vst.msk [vmem:[#allocation0] sm:$0x1] %vm57_vm9, %v56_v24  }
  0x86   :  { %64 = vst.msk [vmem:[#allocation0] sm:$0x1] %vm63_vm10, %v62_v25  }
  0x88   :  { %v68_v26 = vpop.permute.xlu0 %67   ;;  %v74_v27 = vpop.permute.xlu1 %73  }
  0x89   :  { %70 = vst.msk [vmem:[#allocation0] sm:$0x1] %vm69_vm11, %v68_v26  }
  0x8a   :  { %76 = vst.msk [vmem:[#allocation0] sm:$0x1] %vm75_vm12, %v74_v27  }
  0x8c   :  { %v80_v28 = vpop.permute.xlu0 %79   ;;  %v86_v29 = vpop.permute.xlu1 %85  }
  0x8d   :  { %82 = vst.msk [vmem:[#allocation0] sm:$0x1] %vm81_vm13, %v80_v28  }
  0x8e   :  { %88 = vst.msk [vmem:[#allocation0] sm:$0x1] %vm87_vm14, %v86_v29  }
  0x90   :  { %v92_v30 = vpop.permute.xlu0 %91  }
  0x91   :  { %94 = vst.msk [vmem:[#allocation0] sm:$0x1] %vm93_vm15, %v92_v30  }
  0x98   :  { %v99_v31 = vld [vmem:[#allocation0] sm:$0x1] }
  0x99   :  { %102 = vst [vmem:[%s210_s1] sm:$0x1] %v99_v31 }

// kernel: tvqa_forward.1
= control target key start
LH: loop header
LB: loop body
LE: loop exit
PB: predicated region body
PF: predicated region fallthrough
CT: control target
= control target key end

     0   :  { %vm39_vm0 = vcmask 385024   ;;  %v1940_v4 = vmov 0.0   ;;  %vm72_vm1 = vcmask 392192   ;;  %s2470_s0 = inlined_call_operand.vmem [shape: f32[8,16,48], index: 0, kind: input, shape index: {}]   ;;  %s2471_s1 = inlined_call_operand.vmem [shape: f32[3,48,128], index: 1, kind: input, shape index: {}]   ;;  %s2472_s2 = inlined_call_operand.vmem [shape: f32[1,128], index: 2, kind: input, shape index: {}]   ;;  %s2473_s3 = inlined_call_operand.vmem [shape: f32[128,32], index: 3, kind: input, shape index: {}]   ;;  %s2474_s4 = inlined_call_operand.vmem [shape: f32[32,128], index: 4, kind: input, shape index: {}]   ;;  %s2475_s5 = inlined_call_operand.vmem [shape: f32[2,8,32], index: 5, kind: input, shape index: {}]   ;;  %s2476_s6 = inlined_call_operand.vmem [shape: f32[2,8], index: 6, kind: input, shape index: {}]   ;;  %s2477_s7 = inlined_call_operand.vmem [shape: f32[128,32], index: 7, kind: input, shape index: {}]   ;;  %s2478_s8 = inlined_call_operand.vmem [shape: f32[1,32], index: 8, kind: input, shape index: {}]   ;;  %s2479_s9 = inlined_call_operand.vmem [shape: f32[64,5], index: 9, kind: input, shape index: {}]   ;;  %s2480_s10 = inlined_call_operand.vmem [shape: f32[1,5], index: 10, kind: input, shape index: {}]   ;;  %s2481_s11 = inlined_call_operand.hbm [shape: f32[2,5], index: 11, kind: output, shape index: {}]  }
   0x1   :  { %v1438_v0 = vld [vmem:[%s2471_s1 + $0x58] sm:$0xff]  ;;  %v110_v1 = vld [vmem:[%s2471_s1 + $0x28] sm:$0xff]  ;;  %v1437_v2 = vld [vmem:[%s2471_s1 + $0x50] sm:$0xff]  ;;  %40 = vst.msk [vmem:[#allocation2] sm:$0x1] %vm39_vm0, %v1940_v4 }
   0x2   :  { %1641 = vmatprep.subr.mxu0 %v1438_v0  ;;  %1677 = vmatprep.subr.mxu1 %v110_v1  ;;  %v109_v3 = vld [vmem:[%s2471_s1 + $0x20] sm:$0xff]  ;;  %41 = vst.msk [vmem:[#allocation2 + $0x18] sm:$0x1] %vm39_vm0, %v1940_v4  ;;  %42 = vst.msk [vmem:[#allocation2 + $0x30] sm:$0x1] %vm39_vm0, %v1940_v4  ;;  %v1436_v5 = vld [vmem:[%s2471_s1 + $0x48] sm:$0xff] }
   0x3   :  { %43 = vst.msk [vmem:[#allocation2 + $0x48] sm:$0x1] %vm39_vm0, %v1940_v4  ;;  %44 = vst.msk [vmem:[#allocation2 + $0x60] sm:$0x1] %vm39_vm0, %v1940_v4  ;;  %1642 = vmatpush3.msra.mxu0 %v1438_v0  ;;  %1678 = vmatpush3.msra.mxu1 %v110_v1  ;;  %v108_v6 = vld [vmem:[%s2471_s1 + $0x18] sm:$0xff]  ;;  %v1435_v7 = vld [vmem:[%s2471_s1 + $0x40] sm:$0xff] }
   0x4   :  { %45 = vst.msk [vmem:[#allocation2 + $0x78] sm:$0x1] %vm39_vm0, %v1940_v4  ;;  %46 = vst.msk [vmem:[#allocation2 + $0x90] sm:$0x1] %vm39_vm0, %v1940_v4  ;;  %1643 = vmatprep.subr.mxu0 %v1437_v2  ;;  %1679 = vmatprep.subr.mxu1 %v109_v3  ;;  %v107_v8 = vld [vmem:[%s2471_s1 + $0x10] sm:$0xff]  ;;  %v1434_v9 = vld [vmem:[%s2471_s1 + $0x38] sm:$0xff] }
   0x5   :  { %47 = vst.msk [vmem:[#allocation2 + $0xa8] sm:$0x1] %vm39_vm0, %v1940_v4  ;;  %48 = vst.msk [vmem:[#allocation2 + $0x11] sm:$0x1] %vm39_vm0, %v1940_v4  ;;  %1644 = vmatpush3.msra.mxu0 %v1437_v2  ;;  %1680 = vmatpush3.msra.mxu1 %v109_v3  ;;  %v56_v10 = vld [vmem:[%s2470_s0] sm:$0xff]  ;;  %v57_v11 = vld [vmem:[%s2470_s0 + $0x8] sm:$0xff] }
   0x6   :  { %49 = vst.msk [vmem:[#allocation2 + $0x29] sm:$0x1] %vm39_vm0, %v1940_v4  ;;  %50 = vst.msk [vmem:[#allocation2 + $0x41] sm:$0x1] %vm39_vm0, %v1940_v4  ;;  %1645 = vmatprep.subr.mxu0 %v1436_v5  ;;  %1681 = vmatprep.subr.mxu1 %v108_v6  ;;  %v106_v12 = vld [vmem:[%s2471_s1 + $0x8] sm:$0xff]  ;;  %v58_v13 = vld [vmem:[%s2470_s0 + $0x10] sm:$0xff] }
   0x7   :  { %51 = vst.msk [vmem:[#allocation2 + $0x59] sm:$0x1] %vm39_vm0, %v1940_v4  ;;  %52 = vst.msk [vmem:[#allocation2 + $0x71] sm:$0x1] %vm39_vm0, %v1940_v4  ;;  %v59_v14 = vld [vmem:[%s2470_s0 + $0x18] sm:$0xff]  ;;  %1646 = vmatpush3.msra.mxu0 %v1436_v5  ;;  %1682 = vmatpush3.msra.mxu1 %v108_v6  ;;  %v60_v15 = vld [vmem:[%s2470_s0 + $0x20] sm:$0xff] }
   0x8   :  { %53 = vst.msk [vmem:[#allocation2 + $0x89] sm:$0x1] %vm39_vm0, %v1940_v4  ;;  %54 = vst.msk [vmem:[#allocation2 + $0xa1] sm:$0x1] %vm39_vm0, %v1940_v4  ;;  %v61_v16 = vld [vmem:[%s2470_s0 + $0x28] sm:$0xff]  ;;  %v62_v17 = vld [vmem:[%s2470_s0 + $0x30] sm:$0xff]  ;;  %1647 = vmatprep.subr.mxu0 %v1435_v7  ;;  %1683 = vmatprep.subr.mxu1 %v107_v8 }
   0x9   :  { %55 = vst.msk [vmem:[#allocation2 + $0xb9] sm:$0x1] %vm39_vm0, %v1940_v4  ;;  %v1433_v18 = vld [vmem:[%s2471_s1 + $0x30] sm:$0xff]  ;;  %v63_v19 = vld [vmem:[%s2470_s0 + $0x38] sm:$0xff]  ;;  %v64_v20 = vld [vmem:[%s2470_s0 + $0x40] sm:$0xff]  ;;  %1648 = vmatpush3.msra.mxu0 %v1435_v7  ;;  %1684 = vmatpush3.msra.mxu1 %v107_v8 }
   0xa   :  { %73 = vst.msk [vmem:[#allocation2 + $0x1] sm:$0xff] %vm72_vm1, %v56_v10  ;;  %74 = vst.msk [vmem:[#allocation2 + $0x9] sm:$0xff] %vm72_vm1, %v57_v11  ;;  %v105_v21 = vld [vmem:[%s2471_s1] sm:$0xff]  ;;  %v65_v22 = vld [vmem:[%s2470_s0 + $0x48] sm:$0xff]  ;;  %1649 = vmatprep.subr.mxu0 %v1434_v9  ;;  %1685 = vmatprep.subr.mxu1 %v106_v12 }
   0xb   :  { %75 = vst.msk [vmem:[#allocation2 + $0x19] sm:$0xff] %vm72_vm1, %v58_v13  ;;  %76 = vst.msk [vmem:[#allocation2 + $0x21] sm:$0xff] %vm72_vm1, %v59_v14  ;;  %v66_v23 = vld [vmem:[%s2470_s0 + $0x50] sm:$0xff]  ;;  %v67_v24 = vld [vmem:[%s2470_s0 + $0x58] sm:$0xff]  ;;  %1650 = vmatpush3.msra.mxu0 %v1434_v9  ;;  %1686 = vmatpush3.msra.mxu1 %v106_v12 }
   0xc   :  { %77 = vst.msk [vmem:[#allocation2 + $0x31] sm:$0xff] %vm72_vm1, %v60_v15  ;;  %78 = vst.msk [vmem:[#allocation2 + $0x39] sm:$0xff] %vm72_vm1, %v61_v16  ;;  %v68_v25 = vld [vmem:[%s2470_s0 + $0x60] sm:$0xff]  ;;  %v69_v26 = vld [vmem:[%s2470_s0 + $0x68] sm:$0xff]  ;;  %1651 = vmatprep.subr.mxu0 %v1433_v18  ;;  %1687 = vmatprep.subr.mxu1 %v105_v21 }
   0xd   :  { %79 = vst.msk [vmem:[#allocation2 + $0x49] sm:$0xff] %vm72_vm1, %v62_v17  ;;  %80 = vst.msk [vmem:[#allocation2 + $0x51] sm:$0xff] %vm72_vm1, %v63_v19  ;;  %v70_v27 = vld [vmem:[%s2470_s0 + $0x70] sm:$0xff]  ;;  %v1476_v28 = vld [vmem:[%s2471_s1 + $0x88] sm:$0xff] }
   0xe   :  { %81 = vst.msk [vmem:[#allocation2 + $0x61] sm:$0xff] %vm72_vm1, %v64_v20  ;;  %82 = vst.msk [vmem:[#allocation2 + $0x69] sm:$0xff] %vm72_vm1, %v65_v22  ;;  %v71_v29 = vld [vmem:[%s2470_s0 + $0x78] sm:$0xff] }
   0xf   :  { %83 = vst.msk [vmem:[#allocation2 + $0x79] sm:$0xff] %vm72_vm1, %v66_v23  ;;  %84 = vst.msk [vmem:[#allocation2 + $0x81] sm:$0xff] %vm72_vm1, %v67_v24 }
  0x10   :  { %85 = vst.msk [vmem:[#allocation2 + $0x91] sm:$0xff] %vm72_vm1, %v68_v25  ;;  %86 = vst.msk [vmem:[#allocation2 + $0x99] sm:$0xff] %vm72_vm1, %v69_v26 }
  0x11   :  { %87 = vst.msk [vmem:[#allocation2 + $0xa9] sm:$0xff] %vm72_vm1, %v70_v27 }
  0x12   :  { %16 = vsyncpa [#allocation4], 0  ;;  %1652 = vmatpush3.msra.mxu0 %v1433_v18  ;;  %v111_v30 = vld [vmem:[#allocation2 + $0x1] sm:$0xff]  ;;  %1688 = vmatpush3.msra.mxu1 %v105_v21  ;;  %v112_v32 = vld [vmem:[#allocation2 + $0x9] sm:$0xff]  ;;  %88 = vst.msk [vmem:[#allocation2 + $0xb1] sm:$0xff] %vm72_vm1, %v71_v29  ;;  %vm1941_vm2 = vmmov 0  }
  0x13   :  { %v89_v31 = vld [vmem:[#allocation2] sm:$0xff]  ;;  %1653 = vmatprep.mubr.msk.f32.mxu0 %vm72_vm1, %v111_v30  ;;  %v90_v33 = vld [vmem:[#allocation2 + $0x8] sm:$0xff]  ;;  %v91_v35 = vld [vmem:[#allocation2 + $0x18] sm:$0xff]  ;;  %1713 = vmatprep.subr.mxu0 %v1476_v28  ;;  %s1942_s12 = smov 32   ;;  %s1944_s15 = smov 64   ;;  %vm1062_vm3 = vcmask 58368  }
  0x14   :  { %1689 = vmatprep.mubr.msk.f32.mxu1 %vm72_vm1, %v89_v31  ;;  %v113_v34 = vld [vmem:[#allocation2 + $0x19] sm:$0xff]  ;;  %1654 = vmatmul.mubr.msk.f32.vlgmr.msra.gmra.mxu0 %vm72_vm1, %v112_v32  ;;  %v114_v37 = vld [vmem:[#allocation2 + $0x21] sm:$0xff]  ;;  %v115_v39 = vld [vmem:[#allocation2 + $0x31] sm:$0xff]  ;;  %vm1053_vm4 = vcmask 261120   ;;  %vm1055_vm5 = vcmask 523264   ;;  %vm1057_vm6 = vcmask 785408  }
  0x15   :  { %1690 = vmatmul.mubr.msk.f32.vlgmr.msra.gmra.mxu1 %vm72_vm1, %v90_v33  ;;  %v1475_v36 = vld [vmem:[%s2471_s1 + $0x80] sm:$0xff]  ;;  %1656 = vmatprep.mubr.msk.f32.mxu0 %vm72_vm1, %v113_v34  ;;  %v93_v40 = vld [vmem:[#allocation2 + $0x30] sm:$0xff]  ;;  %v1474_v41 = vld [vmem:[%s2471_s1 + $0x78] sm:$0xff]  ;;  %vm1231_vm7 = vcmask 1041409   ;;  %vm1212_vm8 = vcmask 257024   ;;  %vm1234_vm9 = vcmask 25600  }
  0x16   :  { %v92_v38 = vld [vmem:[#allocation2 + $0x20] sm:$0xff]  ;;  %1714 = vmatpush3.msra.mxu0 %v1476_v28  ;;  %1692 = vmatprep.mubr.msk.f32.mxu1 %vm72_vm1, %v91_v35  ;;  %v94_v43 = vld [vmem:[#allocation2 + $0x38] sm:$0xff]  ;;  %v117_v44 = vld [vmem:[#allocation2 + $0x49] sm:$0xff]  ;;  %vm1417_vm10 = vcmask 33792  }
  0x17   :  { %1715 = vmatprep.subr.mxu0 %v1475_v36  ;;  %v116_v42 = vld [vmem:[#allocation2 + $0x39] sm:$0xff]  ;;  %v95_v45 = vld [vmem:[#allocation2 + $0x48] sm:$0xff]  ;;  %v1473_v46 = vld [vmem:[%s2471_s1 + $0x70] sm:$0xff] }
  0x18   :  { %1657 = vmatmul.mubr.msk.f32.gmra.mxu0 %vm72_vm1, %v114_v37  ;;  %v118_v47 = vld [vmem:[#allocation2 + $0x51] sm:$0xff]  ;;  %v119_v49 = vld [vmem:[#allocation2 + $0x61] sm:$0xff]  ;;  %v120_v52 = vld [vmem:[#allocation2 + $0x69] sm:$0xff] }
  0x19   :  { %1693 = vmatmul.mubr.msk.f32.gmra.mxu1 %vm72_vm1, %v92_v38  ;;  %1659 = vmatprep.mubr.msk.f32.mxu0 %vm72_vm1, %v115_v39  ;;  %v96_v48 = vld [vmem:[#allocation2 + $0x50] sm:$0xff]  ;;  %v97_v50 = vld [vmem:[#allocation2 + $0x60] sm:$0xff]  ;;  %v1472_v51 = vld [vmem:[%s2471_s1 + $0x68] sm:$0xff] }
  0x1a   :  { %1695 = vmatprep.mubr.msk.f32.mxu1 %vm72_vm1, %v93_v40  ;;  %1716 = vmatpush3.msra.mxu0 %v1475_v36  ;;  %v98_v53 = vld [vmem:[#allocation2 + $0x68] sm:$0xff]  ;;  %v121_v54 = vld [vmem:[#allocation2 + $0x79] sm:$0xff]  ;;  %v123_v59 = vld [vmem:[#allocation2 + $0x91] sm:$0xff] }
  0x1b   :  { %1717 = vmatprep.subr.mxu0 %v1474_v41  ;;  %v99_v55 = vld [vmem:[#allocation2 + $0x78] sm:$0xff]  ;;  %v1471_v56 = vld [vmem:[%s2471_s1 + $0x60] sm:$0xff]  ;;  %v101_v60 = vld [vmem:[#allocation2 + $0x90] sm:$0xff] }
  0x1c   :  { %1660 = vmatmul.mubr.msk.f32.gmra.mxu0 %vm72_vm1, %v116_v42  ;;  %v122_v57 = vld [vmem:[#allocation2 + $0x81] sm:$0xff]  ;;  %v124_v61 = vld [vmem:[#allocation2 + $0x99] sm:$0xff]  ;;  %v125_v63 = vld [vmem:[#allocation2 + $0xa9] sm:$0xff] }
  0x1d   :  { %1696 = vmatmul.mubr.msk.f32.gmra.mxu1 %vm72_vm1, %v94_v43  ;;  %1662 = vmatprep.mubr.msk.f32.mxu0 %vm72_vm1, %v117_v44  ;;  %v100_v58 = vld [vmem:[#allocation2 + $0x80] sm:$0xff]  ;;  %v102_v62 = vld [vmem:[#allocation2 + $0x98] sm:$0xff]  ;;  %v103_v0 = vld [vmem:[#allocation2 + $0xa8] sm:$0xff] }
  0x1e   :  { %1698 = vmatprep.mubr.msk.f32.mxu1 %vm72_vm1, %v95_v45  ;;  %1718 = vmatpush3.msra.mxu0 %v1474_v41  ;;  %v126_v1 = vld [vmem:[#allocation2 + $0xb1] sm:$0xff]  ;;  %v520_v3 = vld [vmem:[#allocation2 + $0x2] sm:$0xff]  ;;  %v522_v6 = vld [vmem:[#allocation2 + $0x1a] sm:$0xff] }
  0x1f   :  { %1719 = vmatprep.subr.mxu0 %v1473_v46  ;;  %v104_v2 = vld [vmem:[#allocation2 + $0xb0] sm:$0xff]  ;;  %v523_v7 = vld [vmem:[#allocation2 + $0x22] sm:$0xff]  ;;  %v525_v9 = vld [vmem:[#allocation2 + $0x3a] sm:$0xff] }
  0x20   :  { %1663 = vmatmul.mubr.msk.f32.gmra.mxu0 %vm72_vm1, %v118_v47  ;;  %v521_v5 = vld [vmem:[#allocation2 + $0xa] sm:$0xff]  ;;  %v524_v8 = vld [vmem:[#allocation2 + $0x32] sm:$0xff]  ;;  %v528_v12 = vld [vmem:[#allocation2 + $0x62] sm:$0xff] }
  0x21   :  { %1699 = vmatmul.mubr.msk.f32.gmra.mxu1 %vm72_vm1, %v96_v48  ;;  %1665 = vmatprep.mubr.msk.f32.mxu0 %vm72_vm1, %v119_v49  ;;  %v526_v10 = vld [vmem:[#allocation2 + $0x4a] sm:$0xff]  ;;  %v527_v11 = vld [vmem:[#allocation2 + $0x52] sm:$0xff]  ;;  %v530_v14 = vld [vmem:[#allocation2 + $0x7a] sm:$0xff] }
  0x22   :  { %1701 = vmatprep.mubr.msk.f32.mxu1 %vm72_vm1, %v97_v50  ;;  %1720 = vmatpush3.msra.mxu0 %v1473_v46  ;;  %v529_v13 = vld [vmem:[#allocation2 + $0x6a] sm:$0xff]  ;;  %v531_v15 = vld [vmem:[#allocation2 + $0x82] sm:$0xff]  ;;  %v532_v16 = vld [vmem:[#allocation2 + $0x92] sm:$0xff] }
  0x23   :  { %1721 = vmatprep.subr.mxu0 %v1472_v51  ;;  %v533_v17 = vld [vmem:[#allocation2 + $0x9a] sm:$0xff]  ;;  %v534_v18 = vld [vmem:[#allocation2 + $0xaa] sm:$0xff]  ;;  %v535_v19 = vld [vmem:[#allocation2 + $0xb2] sm:$0xff] }
  0x24   :  { %1666 = vmatmul.mubr.msk.f32.gmra.mxu0 %vm72_vm1, %v120_v52  ;;  %v806_v20 = vld [vmem:[%s2473_s3 + $0x78] sm:$0xff]  ;;  %v805_v21 = vld [vmem:[%s2473_s3 + $0x70] sm:$0xff]  ;;  %v804_v22 = vld [vmem:[%s2473_s3 + $0x68] sm:$0xff] }
  0x25   :  { %1702 = vmatmul.mubr.msk.f32.gmra.mxu1 %vm72_vm1, %v98_v53  ;;  %1668 = vmatprep.mubr.msk.f32.mxu0 %vm72_vm1, %v121_v54  ;;  %v803_v23 = vld [vmem:[%s2473_s3 + $0x60] sm:$0xff]  ;;  %v802_v24 = vld [vmem:[%s2473_s3 + $0x58] sm:$0xff]  ;;  %v801_v25 = vld [vmem:[%s2473_s3 + $0x50] sm:$0xff] }
  0x26   :  { %1704 = vmatprep.mubr.msk.f32.mxu1 %vm72_vm1, %v99_v55  ;;  %1722 = vmatpush3.msra.mxu0 %v1472_v51  ;;  %v800_v26 = vld [vmem:[%s2473_s3 + $0x48] sm:$0xff]  ;;  %v799_v27 = vld [vmem:[%s2473_s3 + $0x40] sm:$0xff]  ;;  %v798_v28 = vld [vmem:[%s2473_s3 + $0x38] sm:$0xff] }
  0x27   :  { %1723 = vmatprep.subr.mxu0 %v1471_v56  ;;  %1749 = vmatprep.subr.mxu1 %v806_v20  ;;  %v797_v29 = vld [vmem:[%s2473_s3 + $0x30] sm:$0xff]  ;;  %v796_v30 = vld [vmem:[%s2473_s3 + $0x28] sm:$0xff]  ;;  %v795_v31 = vld [vmem:[%s2473_s3 + $0x20] sm:$0xff] }
  0x28   :  { %1669 = vmatmul.mubr.msk.f32.gmra.mxu0 %vm72_vm1, %v122_v57  ;;  %1750 = vmatpush3.msra.mxu1 %v806_v20  ;;  %v794_v32 = vld [vmem:[%s2473_s3 + $0x18] sm:$0xff]  ;;  %v793_v33 = vld [vmem:[%s2473_s3 + $0x10] sm:$0xff]  ;;  %v792_v34 = vld [vmem:[%s2473_s3 + $0x8] sm:$0xff] }
  0x29   :  { %1705 = vmatmul.mubr.msk.f32.gmra.mxu1 %vm72_vm1, %v100_v58  ;;  %1671 = vmatprep.mubr.msk.f32.mxu0 %vm72_vm1, %v123_v59  ;;  %v791_v35 = vld [vmem:[%s2473_s3] sm:$0xff] }
  0x2a   :  { %1707 = vmatprep.mubr.msk.f32.mxu1 %vm72_vm1, %v101_v60  ;;  %1724 = vmatpush3.msra.mxu0 %v1471_v56 }
  0x2b   :  { %1751 = vmatprep.subr.mxu1 %v805_v21 }
  0x2c   :  { %1672 = vmatmul.mubr.msk.f32.gmra.mxu0 %vm72_vm1, %v124_v61  ;;  %1752 = vmatpush3.msra.mxu1 %v805_v21 }
  0x2d   :  { %1708 = vmatmul.mubr.msk.f32.gmra.mxu1 %vm72_vm1, %v102_v62  ;;  %1674 = vmatprep.mubr.msk.f32.mxu0 %vm72_vm1, %v125_v63 }
  0x2e   :  { %1710 = vmatprep.mubr.msk.f32.mxu1 %vm72_vm1, %v103_v0  ;;  %1753 = vmatprep.subr.mxu1 %v804_v22 }
  0x2f   :  { %1754 = vmatpush3.msra.mxu1 %v804_v22 }
  0x30   :  { %1675 = vmatmul.mubr.msk.f32.gmra.mxu0 %vm72_vm1, %v126_v1  ;;  %1755 = vmatprep.subr.mxu1 %v803_v23  ;;  %v2269_v1 = vld [vmem:[%s2472_s2] ss:$0 sm:$0xff] }
  0x31   :  { %1711 = vmatmul.mubr.msk.f32.gmra.mxu1 %vm72_vm1, %v104_v2  ;;  %1725 = vmatprep.mubr.msk.f32.mxu0 %vm72_vm1, %v520_v3 }
  0x32   :  { %1756 = vmatpush3.msra.mxu1 %v803_v23 }
  0x33   :  { %1757 = vmatprep.subr.mxu1 %v802_v24 }
  0x34   :  { %1726 = vmatmul.mubr.msk.f32.vlgmr.msra.gmra.mxu0 %vm72_vm1, %v521_v5  ;;  %1758 = vmatpush3.msra.mxu1 %v802_v24 }
  0x35   :  { %1728 = vmatprep.mubr.msk.f32.mxu0 %vm72_vm1, %v522_v6  ;;  %1759 = vmatprep.subr.mxu1 %v801_v25 }
  0x36   :  { %1760 = vmatpush3.msra.mxu1 %v801_v25 }
  0x37   :  { %1761 = vmatprep.subr.mxu1 %v800_v26 }
  0x38   :  { %1729 = vmatmul.mubr.msk.f32.gmra.mxu0 %vm72_vm1, %v523_v7  ;;  %1762 = vmatpush3.msra.mxu1 %v800_v26 }
  0x39   :  { %1731 = vmatprep.mubr.msk.f32.mxu0 %vm72_vm1, %v524_v8  ;;  %1763 = vmatprep.subr.mxu1 %v799_v27 }
  0x3a   :  { %1764 = vmatpush3.msra.mxu1 %v799_v27 }
  0x3b   :  { %1765 = vmatprep.subr.mxu1 %v798_v28 }
  0x3c   :  { %1732 = vmatmul.mubr.msk.f32.gmra.mxu0 %vm72_vm1, %v525_v9  ;;  %1766 = vmatpush3.msra.mxu1 %v798_v28 }
  0x3d   :  { %1734 = vmatprep.mubr.msk.f32.mxu0 %vm72_vm1, %v526_v10  ;;  %1767 = vmatprep.subr.mxu1 %v797_v29 }
  0x3e   :  { %1768 = vmatpush3.msra.mxu1 %v797_v29 }
  0x3f   :  { %1769 = vmatprep.subr.mxu1 %v796_v30 }
  0x40   :  { %1735 = vmatmul.mubr.msk.f32.gmra.mxu0 %vm72_vm1, %v527_v11  ;;  %1770 = vmatpush3.msra.mxu1 %v796_v30 }
  0x41   :  { %1737 = vmatprep.mubr.msk.f32.mxu0 %vm72_vm1, %v528_v12  ;;  %1771 = vmatprep.subr.mxu1 %v795_v31 }
  0x42   :  { %1772 = vmatpush3.msra.mxu1 %v795_v31 }
  0x43   :  { %1773 = vmatprep.subr.mxu1 %v794_v32 }
  0x44   :  { %1738 = vmatmul.mubr.msk.f32.gmra.mxu0 %vm72_vm1, %v529_v13  ;;  %1774 = vmatpush3.msra.mxu1 %v794_v32 }
  0x45   :  { %1740 = vmatprep.mubr.msk.f32.mxu0 %vm72_vm1, %v530_v14  ;;  %1775 = vmatprep.subr.mxu1 %v793_v33 }
  0x46   :  { %1776 = vmatpush3.msra.mxu1 %v793_v33 }
  0x47   :  { %1777 = vmatprep.subr.mxu1 %v792_v34 }
  0x48   :  { %1741 = vmatmul.mubr.msk.f32.gmra.mxu0 %vm72_vm1, %v531_v15  ;;  %1778 = vmatpush3.msra.mxu1 %v792_v34 }
  0x49   :  { %1743 = vmatprep.mubr.msk.f32.mxu0 %vm72_vm1, %v532_v16  ;;  %1779 = vmatprep.subr.mxu1 %v791_v35 }
  0x4a   :  { %1780 = vmatpush3.msra.mxu1 %v791_v35 }
  0x4b   :  { %1843 = vmatprep.subr.mxu1 %v1940_v4 }
  0x4c   :  { %1744 = vmatmul.mubr.msk.f32.gmra.mxu0 %vm72_vm1, %v533_v17 }
  0x4d   :  { %1746 = vmatprep.mubr.msk.f32.mxu0 %vm72_vm1, %v534_v18 }
  0x50   :  { %1747 = vmatmul.mubr.msk.f32.gmra.mxu0 %vm72_vm1, %v535_v19 }
  0xd4   :  { %v1655_v36 = vpop.f32.mrf.mxu0 }
  0xd5   :  { %v1691_v37 = vpop.f32.mrf.mxu1 }
  0xd6   :  { %v248_v38 = vpop.f32.mrf.mxu0  ;;  %v447_v61 = vadd.f32 %v1691_v37, %v1655_v36 }
  0xd7   :  { %v441_v39 = vpop.f32.mrf.mxu1 }
  0xd8   :  { %v1658_v40 = vpop.f32.mrf.mxu0  ;;  %v442_v63 = vadd.f32 %v441_v39, %v248_v38 }
  0xd9   :  { %v1694_v41 = vpop.f32.mrf.mxu1 }
  0xda   :  { %v258_v42 = vpop.f32.mrf.mxu0  ;;  %v457_v5 = vadd.f32 %v1694_v41, %v1658_v40 }
  0xdb   :  { %v451_v44 = vpop.f32.mrf.mxu1 }
  0xdc   :  { %v1661_v43 = vpop.f32.mrf.mxu0  ;;  %v452_v9 = vadd.f32 %v451_v44, %v258_v42 }
  0xdd   :  { %v1697_v47 = vpop.f32.mrf.mxu1 }
  0xde   :  { %v268_v45 = vpop.f32.mrf.mxu0  ;;  %v467_v14 = vadd.f32 %v1697_v47, %v1661_v43 }
  0xdf   :  { %v461_v50 = vpop.f32.mrf.mxu1 }
  0xe0   :  { %v1664_v46 = vpop.f32.mrf.mxu0  ;;  %v462_v20 = vadd.f32 %v461_v50, %v268_v45 }
  0xe1   :  { %v1700_v53 = vpop.f32.mrf.mxu1 }
  0xe2   :  { %v278_v48 = vpop.f32.mrf.mxu0  ;;  %v477_v25 = vadd.f32 %v1700_v53, %v1664_v46 }
  0xe3   :  { %v471_v56 = vpop.f32.mrf.mxu1 }
  0xe4   :  { %v1667_v49 = vpop.f32.mrf.mxu0  ;;  %v472_v31 = vadd.f32 %v471_v56, %v278_v48 }
  0xe5   :  { %v1703_v59 = vpop.f32.mrf.mxu1 }
  0xe6   :  { %v288_v51 = vpop.f32.mrf.mxu0  ;;  %v487_v36 = vadd.f32 %v1703_v59, %v1667_v49 }
  0xe7   :  { %v481_v2 = vpop.f32.mrf.mxu1 }
  0xe8   :  { %v2254_v52 = vpop.f32.mrf.mxu0  ;;  %v482_v42 = vadd.f32 %v481_v2, %v288_v51 }
  0xe9   :  { %v1706_v12 = vpop.f32.mrf.mxu1 }
  0xea   :  { %v2256_v54 = vpop.f32.mrf.mxu0  ;;  %v497_v47 = vadd.f32 %v1706_v12, %v2254_v52 }
  0xeb   :  { %v491_v23 = vpop.f32.mrf.mxu1 }
  0xec   :  { %v2258_v55 = vpop.f32.mrf.mxu0  ;;  %v492_v59 = vadd.f32 %v491_v23, %v2256_v54 }
  0xed   :  { %v1709_v34 = vpop.f32.mrf.mxu1 }
  0xee   :  { %v2260_v57 = vpop.f32.mrf.mxu0 }
  0xef   :  { %v501_v45 = vpop.f32.mrf.mxu1 }
  0xf0   :  { %v2262_v58 = vpop.f32.mrf.mxu0 }
  0xf2   :  { %v2264_v60 = vpop.f32.mrf.mxu0 }
  0xf4   :  { %v1727_v62 = vpop.f32.mrf.mxu0 }
  0xf5   :  { %v737_v0 = vadd.f32 %v1727_v62, %v447_v61  ;;  %v1712_v62 = vpop.f32.mrf.mxu1 }
  0xf6   :  { %v657_v3 = vpop.f32.mrf.mxu0 }
  0xf7   :  { %v736_v6 = vadd.f32 %v657_v3, %v442_v63  ;;  %v760_v7 = vadd.f32 %v2269_v1, %v737_v0  ;;  %v507_v0 = vadd.f32 %v1709_v34, %v2258_v55 }
  0xf8   :  { %v1730_v8 = vpop.f32.mrf.mxu0 }
  0xf9   :  { %v759_v10 = vadd.f32 %v2269_v1, %v736_v6  ;;  %v739_v11 = vadd.f32 %v1730_v8, %v457_v5  ;;  %v776_v17 = vmax.f32 %v760_v7, 0.0  ;;  %v502_v7 = vadd.f32 %v501_v45, %v2260_v57  ;;  %v1118_v45 = vld [vmem:[%s2477_s7 + $0x68] sm:$0xff] }
  0xfa   :  { %v667_v13 = vpop.f32.mrf.mxu0 }
  0xfb   :  { %v775_v15 = vmax.f32 %v759_v10, 0.0  ;;  %v738_v16 = vadd.f32 %v667_v13, %v452_v9  ;;  %v762_v18 = vadd.f32 %v2269_v1, %v739_v11  ;;  %v511_v9 = vpop.f32.mrf.mxu1  ;;  %v517_v11 = vadd.f32 %v1712_v62, %v2262_v58  ;;  %v1107_v62 = vld [vmem:[%s2477_s7 + $0x10] sm:$0xff] }
  0xfc   :  { %v1733_v19 = vpop.f32.mrf.mxu0 }
  0xfd   :  { %v761_v21 = vadd.f32 %v2269_v1, %v738_v16  ;;  %v741_v22 = vadd.f32 %v1733_v19, %v467_v14  ;;  %1781 = vmatprep.mubr.f32.mxu1 %v775_v15  ;;  %v778_v28 = vmax.f32 %v762_v18, 0.0  ;;  %v512_v16 = vadd.f32 %v511_v9, %v2264_v60  ;;  %v952_v60 = vld [vmem:[%s2474_s4] sm:$0xff] }
  0xfe   :  { %v677_v24 = vpop.f32.mrf.mxu0  ;;  %1782 = vmatmul.mubr.f32.vlgmr.msra.gmra.mxu1 %v776_v17  ;;  %1837 = vmatprep.mubr.f32.mxu0 %v952_v60 }
  0xff   :  { %v777_v26 = vmax.f32 %v761_v21, 0.0  ;;  %v740_v27 = vadd.f32 %v677_v24, %v462_v20  ;;  %v764_v29 = vadd.f32 %v2269_v1, %v741_v22 }
 0x100   :  { %v1736_v30 = vpop.f32.mrf.mxu0 }
 0x101   :  { %v763_v32 = vadd.f32 %v2269_v1, %v740_v27  ;;  %v743_v33 = vadd.f32 %v1736_v30, %v477_v25  ;;  %1784 = vmatprep.mubr.f32.mxu1 %v777_v26  ;;  %v780_v39 = vmax.f32 %v764_v29, 0.0 }
 0x102   :  { %v687_v35 = vpop.f32.mrf.mxu0  ;;  %1785 = vmatmul.mubr.f32.gmra.mxu1 %v778_v28 }
 0x103   :  { %v779_v37 = vmax.f32 %v763_v32, 0.0  ;;  %v742_v38 = vadd.f32 %v687_v35, %v472_v31  ;;  %v766_v40 = vadd.f32 %v2269_v1, %v743_v33 }
 0x104   :  { %v1739_v41 = vpop.f32.mrf.mxu0 }
 0x105   :  { %v765_v43 = vadd.f32 %v2269_v1, %v742_v38  ;;  %v745_v44 = vadd.f32 %v1739_v41, %v487_v36  ;;  %1787 = vmatprep.mubr.f32.mxu1 %v779_v37  ;;  %v782_v53 = vmax.f32 %v766_v40, 0.0  ;;  %v953_v40 = vld [vmem:[%s2474_s4 + $0x8] sm:$0xff]  ;;  %v954_v41 = vld [vmem:[%s2474_s4 + $0x10] sm:$0xff] }
 0x106   :  { %v697_v46 = vpop.f32.mrf.mxu0  ;;  %1788 = vmatmul.mubr.f32.gmra.mxu1 %v780_v39 }
 0x107   :  { %v781_v48 = vmax.f32 %v765_v43, 0.0  ;;  %v744_v50 = vadd.f32 %v697_v46, %v482_v42  ;;  %v768_v49 = vadd.f32 %v2269_v1, %v745_v44  ;;  %v955_v42 = vld [vmem:[%s2474_s4 + $0x18] sm:$0xff]  ;;  %v1119_v44 = vld [vmem:[%s2477_s7 + $0x70] sm:$0xff]  ;;  %v1117_v46 = vld [vmem:[%s2477_s7 + $0x60] sm:$0xff] }
 0x108   :  { %v1742_v56 = vpop.f32.mrf.mxu0  ;;  %v1120_v43 = vld [vmem:[%s2477_s7 + $0x78] sm:$0xff] }
 0x109   :  { %v767_v61 = vadd.f32 %v2269_v1, %v744_v50  ;;  %v747_v51 = vadd.f32 %v1742_v56, %v497_v47  ;;  %1790 = vmatprep.mubr.f32.mxu1 %v781_v48  ;;  %v784_v52 = vmax.f32 %v768_v49, 0.0  ;;  %1844 = vmatpush3.msra.mxu1 %v1120_v43  ;;  %v1116_v47 = vld [vmem:[%s2477_s7 + $0x58] sm:$0xff]  ;;  %v1115_v48 = vld [vmem:[%s2477_s7 + $0x50] sm:$0xff]  ;;  %v1114_v50 = vld [vmem:[%s2477_s7 + $0x48] sm:$0xff] }
 0x10a   :  { %v707_v63 = vpop.f32.mrf.mxu0  ;;  %1791 = vmatmul.mubr.f32.gmra.mxu1 %v782_v53  ;;  %1845 = vmatprep.subr.mxu1 %v1940_v4  ;;  %v1113_v53 = vld [vmem:[%s2477_s7 + $0x40] sm:$0xff]  ;;  %v1112_v49 = vld [vmem:[%s2477_s7 + $0x38] sm:$0xff]  ;;  %v1111_v56 = vld [vmem:[%s2477_s7 + $0x30] sm:$0xff] }
 0x10b   :  { %v783_v2 = vmax.f32 %v767_v61, 0.0  ;;  %v746_v3 = vadd.f32 %v707_v63, %v492_v59  ;;  %v770_v5 = vadd.f32 %v2269_v1, %v747_v51  ;;  %1846 = vmatpush3.msra.mxu1 %v1119_v44  ;;  %v1110_v59 = vld [vmem:[%s2477_s7 + $0x28] sm:$0xff]  ;;  %v1109_v61 = vld [vmem:[%s2477_s7 + $0x20] sm:$0xff]  ;;  %v1108_v51 = vld [vmem:[%s2477_s7 + $0x18] sm:$0xff] }
 0x10c   :  { %v1745_v6 = vpop.f32.mrf.mxu0  ;;  %1847 = vmatprep.subr.mxu1 %v1940_v4  ;;  %v1106_v63 = vld [vmem:[%s2477_s7 + $0x8] sm:$0xff]  ;;  %v1494_v43 = vld [vmem:[%s2478_s8] ss:$0 sm:$0xff] }
 0x10d   :  { %v769_v8 = vadd.f32 %v2269_v1, %v746_v3  ;;  %v749_v54 = vadd.f32 %v1745_v6, %v507_v0  ;;  %1793 = vmatprep.mubr.f32.mxu1 %v783_v2  ;;  %v786_v55 = vmax.f32 %v770_v5, 0.0  ;;  %1848 = vmatpush3.msra.mxu1 %v1118_v45  ;;  %v1105_v0 = vld [vmem:[%s2477_s7] sm:$0xff]  ;;  %v1067_v2 = vlaneseq  ;;  %s1943_s7 = smov 96  }
 0x10e   :  { %v717_v10 = vpop.f32.mrf.mxu0  ;;  %1794 = vmatmul.mubr.f32.gmra.mxu1 %v784_v52  ;;  %1849 = vmatprep.subr.mxu1 %v1940_v4 }
 0x10f   :  { %v785_v12 = vmax.f32 %v769_v8, 0.0  ;;  %v748_v13 = vadd.f32 %v717_v10, %v502_v7  ;;  %v772_v14 = vadd.f32 %v2269_v1, %v749_v54  ;;  %1850 = vmatpush3.msra.mxu1 %v1117_v46  ;;  %v2372_v3 = vshrl.u32 %v1067_v2, 7  ;;  %v1061_v54 = vld [vmem:[%s2476_s6] sm:$0x3] }
 0x110   :  { %v1748_v15 = vpop.f32.mrf.mxu0  ;;  %1851 = vmatprep.subr.mxu1 %v1940_v4 }
 0x111   :  { %v771_v17 = vadd.f32 %v2269_v1, %v748_v13  ;;  %v751_v57 = vadd.f32 %v1748_v15, %v517_v11  ;;  %1796 = vmatprep.mubr.f32.mxu1 %v785_v12  ;;  %v788_v21 = vmax.f32 %v772_v14, 0.0  ;;  %1852 = vmatpush3.msra.mxu1 %v1116_v47  ;;  %v2376_v6 = vsub.s32 0, %v2372_v3 }
 0x112   :  { %v727_v18 = vpop.f32.mrf.mxu0  ;;  %1797 = vmatmul.mubr.f32.gmra.mxu1 %v786_v55  ;;  %1853 = vmatprep.subr.mxu1 %v1940_v4  ;;  %v2383_v10 = vsub.s32 1, %v2372_v3  ;;  %v1063_v12 = vsel %vm1062_vm3, %v1061_v54, 0.0 }
 0x113   :  { %v787_v19 = vmax.f32 %v771_v17, 0.0  ;;  %v750_v20 = vadd.f32 %v727_v18, %v512_v16  ;;  %v774_v22 = vadd.f32 %v2269_v1, %v751_v57  ;;  %1854 = vmatpush3.msra.mxu1 %v1115_v48  ;;  %v1070_v9 = vrot.slane %v1061_v54, %v2376_v6  ;;  %v1059_v18 = vld [vmem:[%s2475_s5] sm:$0xff] }
 0x114   :  { %1855 = vmatprep.subr.mxu1 %v1940_v4  ;;  %v1077_v11 = vrot.slane %v1061_v54, %v2383_v10  ;;  %v1945_v54 = vmov 0  }
 0x115   :  { %v773_v58 = vadd.f32 %v2269_v1, %v750_v20  ;;  %1799 = vmatprep.mubr.f32.mxu1 %v787_v19  ;;  %v790_v24 = vmax.f32 %v774_v22, 0.0  ;;  %1856 = vmatpush3.msra.mxu1 %v1114_v50  ;;  %v1060_v19 = vld [vmem:[%s2475_s5 + $0x8] sm:$0xff] }
 0x116   :  { %1800 = vmatmul.mubr.f32.gmra.mxu1 %v788_v21  ;;  %1857 = vmatprep.subr.mxu1 %v1940_v4 }
 0x117   :  { %v789_v23 = vmax.f32 %v773_v58, 0.0  ;;  %1858 = vmatpush3.msra.mxu1 %v1113_v53  ;;  %1905 = vset.pattern.permute.xlu1 %v1945_v54 }
 0x118   :  { %1859 = vmatprep.subr.mxu1 %v1940_v4  ;;  %1904 = vset.pattern.permute.xlu0 %v1945_v54 }
 0x119   :  { %1802 = vmatprep.mubr.f32.mxu1 %v789_v23  ;;  %1860 = vmatpush3.msra.mxu1 %v1112_v49 }
 0x11a   :  { %1803 = vmatmul.mubr.f32.gmra.mxu1 %v790_v24  ;;  %1861 = vmatprep.subr.mxu1 %v1940_v4 }
 0x11b   :  { %1862 = vmatpush3.msra.mxu1 %v1111_v56  ;;  %1875 = vmatprep.mubr.msk.f32.mxu1 %vm1941_vm2, %v1940_v4 }
 0x11c   :  { %1863 = vmatprep.subr.mxu1 %v1940_v4 }
 0x11d   :  { %1864 = vmatpush3.msra.mxu1 %v1110_v59 }
 0x11e   :  { %1865 = vmatprep.subr.mxu1 %v1940_v4 }
 0x11f   :  { %1866 = vmatpush3.msra.mxu1 %v1109_v61 }
 0x120   :  { %1867 = vmatprep.subr.mxu1 %v1940_v4 }
 0x121   :  { %1868 = vmatpush3.msra.mxu1 %v1108_v51  ;;  %v1222_v51 = vand.u32 127, %v1067_v2 }
 0x122   :  { %1869 = vmatprep.subr.mxu1 %v1940_v4 }
 0x123   :  { %1870 = vmatpush3.msra.mxu1 %v1107_v62  ;;  %v1225_v62 = vsub.s32 %v1222_v51, %v2372_v3 }
 0x124   :  { %1871 = vmatprep.subr.mxu1 %v1940_v4 }
 0x125   :  { %1872 = vmatpush3.msra.mxu1 %v1106_v63 }
 0x126   :  { %1873 = vmatprep.subr.mxu1 %v1940_v4 }
 0x127   :  { %1874 = vmatpush3.msra.mxu1 %v1105_v0 }
 0x1be   :  { %v1783_v25 = vpop.f32.mrf.mxu1 }
 0x1c0   :  { %v873_v26 = vpop.f32.mrf.mxu1 }
 0x1c2   :  { %v1786_v27 = vpop.f32.mrf.mxu1 }
 0x1c4   :  { %v883_v28 = vpop.f32.mrf.mxu1 }
 0x1c6   :  { %v1789_v29 = vpop.f32.mrf.mxu1 }
 0x1c8   :  { %v893_v30 = vpop.f32.mrf.mxu1 }
 0x1ca   :  { %v1792_v31 = vpop.f32.mrf.mxu1 }
 0x1cc   :  { %v903_v32 = vpop.f32.mrf.mxu1 }
 0x1ce   :  { %v1795_v1 = vpop.f32.mrf.mxu1 }
 0x1d0   :  { %v913_v33 = vpop.f32.mrf.mxu1 }
 0x1d2   :  { %v1798_v34 = vpop.f32.mrf.mxu1 }
 0x1d4   :  { %v923_v35 = vpop.f32.mrf.mxu1 }
 0x1d6   :  { %v1801_v36 = vpop.f32.mrf.mxu1 }
 0x1d8   :  { %v933_v37 = vpop.f32.mrf.mxu1 }
 0x1da   :  { %v1804_v38 = vpop.f32.mrf.mxu1 }
 0x1db   :  { %1805 = vmatprep.subr.mxu0 %v1804_v38 }
 0x1dc   :  { %v943_v39 = vpop.f32.mrf.mxu1  ;;  %1806 = vmatpush3.msra.mxu0 %v1804_v38 }
 0x1dd   :  { %1807 = vmatprep.subr.mxu0 %v943_v39 }
 0x1de   :  { %1808 = vmatpush3.msra.mxu0 %v943_v39 }
 0x1df   :  { %1809 = vmatprep.subr.mxu0 %v1801_v36 }
 0x1e0   :  { %1810 = vmatpush3.msra.mxu0 %v1801_v36 }
 0x1e1   :  { %1811 = vmatprep.subr.mxu0 %v933_v37 }
 0x1e2   :  { %1812 = vmatpush3.msra.mxu0 %v933_v37 }
 0x1e3   :  { %1813 = vmatprep.subr.mxu0 %v1798_v34 }
 0x1e4   :  { %1814 = vmatpush3.msra.mxu0 %v1798_v34 }
 0x1e5   :  { %1815 = vmatprep.subr.mxu0 %v923_v35 }
 0x1e6   :  { %1816 = vmatpush3.msra.mxu0 %v923_v35 }
 0x1e7   :  { %1817 = vmatprep.subr.mxu0 %v1795_v1 }
 0x1e8   :  { %1818 = vmatpush3.msra.mxu0 %v1795_v1 }
 0x1e9   :  { %1819 = vmatprep.subr.mxu0 %v913_v33 }
 0x1ea   :  { %1820 = vmatpush3.msra.mxu0 %v913_v33 }
 0x1eb   :  { %1821 = vmatprep.subr.mxu0 %v1792_v31 }
 0x1ec   :  { %1822 = vmatpush3.msra.mxu0 %v1792_v31 }
 0x1ed   :  { %1823 = vmatprep.subr.mxu0 %v903_v32 }
 0x1ee   :  { %1824 = vmatpush3.msra.mxu0 %v903_v32 }
 0x1ef   :  { %1825 = vmatprep.subr.mxu0 %v1789_v29 }
 0x1f0   :  { %1826 = vmatpush3.msra.mxu0 %v1789_v29 }
 0x1f1   :  { %1827 = vmatprep.subr.mxu0 %v893_v30 }
 0x1f2   :  { %1828 = vmatpush3.msra.mxu0 %v893_v30 }
 0x1f3   :  { %1829 = vmatprep.subr.mxu0 %v1786_v27 }
 0x1f4   :  { %1830 = vmatpush3.msra.mxu0 %v1786_v27 }
 0x1f5   :  { %1831 = vmatprep.subr.mxu0 %v883_v28 }
 0x1f6   :  { %1832 = vmatpush3.msra.mxu0 %v883_v28 }
 0x1f7   :  { %1833 = vmatprep.subr.mxu0 %v1783_v25 }
 0x1f8   :  { %1834 = vmatpush3.msra.mxu0 %v1783_v25 }
 0x1f9   :  { %1835 = vmatprep.subr.mxu0 %v873_v26 }
 0x1fa   :  { %1836 = vmatpush3.msra.mxu0 %v873_v26 }
 0x1fb   :  { %1838 = vmatmul.mubr.f32.vlgmr.msra.gmra.mxu0 %v953_v40  ;;  %1878 = vmatprep.subr.mxu0 %v1940_v4 }
 0x1fc   :  { %1840 = vmatprep.mubr.f32.mxu0 %v954_v41 }
 0x1ff   :  { %1841 = vmatmul.mubr.f32.gmra.mxu0 %v955_v42 }
 0x200   :  { %1894 = vmatprep.mubr.msk.f32.mxu0 %vm1941_vm2, %v1940_v4 }
 0x2bb   :  { %v1839_v52 = vpop.f32.mrf.mxu0 }
 0x2bc   :  { %1042 = vrot.lane.b32.xlu0 %v1839_v52, %s1942_s12 }
 0x2bd   :  { %v1022_v5 = vpop.f32.mrf.mxu0 }
 0x2bf   :  { %v1842_v7 = vpop.f32.mrf.mxu0 }
 0x2c0   :  { %1050 = vrot.lane.b32.xlu1 %v1842_v7, %s1943_s7  ;;  %s1946_s7 = smov [#allocation3]  }
 0x2c1   :  { %v1032_v8 = vpop.f32.mrf.mxu0  ;;  %s1425_s13 = sshll.u32 %s1946_s7, 4  ;;  %s1426_s13 = int_to_ptr.vmem [resolvable:$true] %s1425_s13 }
 0x2c2   :  { %1046 = vrot.lane.b32.xlu0 %v1032_v8, %s1944_s15  ;;  %s1918_s14 = scalar_lea.vmem %s1426_s13, 32  ;;  %p1923_p1 = scmp.lt.s32.totalorder %s1426_s13, %s1426_s13 }
 0x2c3   :  { %p1919_p0 = scmp.ne.s32.totalorder %s1426_s13, %s1918_s14  ;;  %p1924_p2 = scmp.lt.s32.totalorder %s1918_s14, %s1918_s14 }
 0x2c5   :  { %p1925_p3 = por %p1924_p2, %p1923_p1 }
 0x2c6   :  { %1072 = vbcast.lane.b32.xlu0 %v1070_v9, 256 }
 0x2c7   :  { %p1926_p4 = pnand %p1925_p3, %p1919_p0 }
 0x2ca   :  { %1079 = vbcast.lane.b32.xlu0 %v1077_v11, 256 }
 0x2e4   :  { %1064 = vadd.xlane.f32.xlu1 %v1063_v12 }
 0x32e   :  { %v1043_v13 = vpop.permute.xlu0 %1042 }
 0x32f   :  { %v1054_v55 = vsel %vm1053_vm4, %v1022_v5, %v1043_v13 }
 0x332   :  { %v1051_v15 = vpop.permute.xlu1 %1050 }
 0x334   :  { %v1047_v14 = vpop.permute.xlu0 %1046 }
 0x335   :  { %v1056_v16 = vsel %vm1055_vm5, %v1054_v55, %v1047_v14 }
 0x336   :  { %v1058_v17 = vsel %vm1057_vm6, %v1056_v16, %v1051_v15 }
 0x337   :  { %1876 = vmatmul.mubr.f32.vlgmr.msra.gmra.mxu1 %v1058_v17 }
 0x338   :  { %v1073_v57 = vpop.permute.xlu0 %1072 }
 0x339   :  { %v1081_v21 = vmul.f32 %v1073_v57, %v1059_v18 }
 0x33b   :  { %v1083_v58 = vsel %vm1053_vm4, %v1081_v21, 0.0 }
 0x33c   :  { %v1080_v20 = vpop.permute.xlu0 %1079  ;;  %v1084_v24 = vrot.slane %v1083_v58, 4 }
 0x33d   :  { %v1082_v22 = vmul.f32 %v1080_v20, %v1060_v19 }
 0x33e   :  { %v1085_v25 = vadd.f32 %v1084_v24, %v1083_v58 }
 0x33f   :  { %v1090_v23 = vsel %vm1053_vm4, %v1082_v22, 0.0 }
 0x340   :  { %v1091_v60 = vrot.slane %v1090_v23, 4  ;;  %v1086_v29 = vrot.slane %v1085_v25, 2 }
 0x342   :  { %v1092_v26 = vadd.f32 %v1091_v60, %v1090_v23  ;;  %v1087_v32 = vadd.f32 %v1086_v29, %v1085_v25  ;;  %v1331_v29 = vld [vmem:[%s2479_s9 + $0x10] sm:$0xff] }
 0x344   :  { %v1093_v31 = vrot.slane %v1092_v26, 2  ;;  %v1088_v33 = vrot.slane %v1087_v32, 1 }
 0x346   :  { %v1094_v1 = vadd.f32 %v1093_v31, %v1092_v26  ;;  %v1089_v35 = vadd.f32 %v1088_v33, %v1087_v32  ;;  %v1336_v26 = vld [vmem:[%s2479_s9 + $0x38] sm:$0xff] }
 0x347   :  { %1879 = vmatpush3.msra.mxu0 %v1336_v26 }
 0x348   :  { %v1095_v34 = vrot.slane %v1094_v1, 1  ;;  %1880 = vmatprep.subr.mxu0 %v1940_v4 }
 0x34a   :  { %v1096_v36 = vadd.f32 %v1095_v34, %v1094_v1 }
 0x36d   :  { %v1065_v27 = vpop.xlane.xlu1 %1064 }
 0x36e   :  { %v1066_v28 = vmax.f32 %v1065_v27, 1.0  ;;  %v1335_v27 = vld [vmem:[%s2479_s9 + $0x30] sm:$0xff] }
 0x36f   :  { %1881 = vmatpush3.msra.mxu0 %v1335_v27 }
 0x370   :  { %v1098_v30 = vrot.slane %v1066_v28, 1  ;;  %1906 = vrcp.f32 %v1066_v28  ;;  %1882 = vmatprep.subr.mxu0 %v1940_v4  ;;  %v1332_v28 = vld [vmem:[%s2479_s9 + $0x18] sm:$0xff] }
 0x372   :  { %1908 = vrcp.f32 %v1098_v30  ;;  %v1330_v30 = vld [vmem:[%s2479_s9 + $0x8] sm:$0xff] }
 0x37d   :  { %v1907_v37 = vpop.eup %1906 }
 0x37e   :  { %v1102_v39 = vmul.f32 %v1907_v37, %v1089_v35 }
 0x37f   :  { %v1909_v38 = vpop.eup %1908 }
 0x380   :  { %v1104_v40 = vmul.f32 %v1909_v38, %v1096_v36  ;;  %v1205_v48 = vrot.slane %v1102_v39, %v2376_v6 }
 0x382   :  { %v1319_v41 = vrot.slane %v1104_v40, 7  ;;  %v1209_v49 = vrot.slane %v1104_v40, %v2376_v6  ;;  %v1329_v40 = vld [vmem:[%s2479_s9] sm:$0xff] }
 0x384   :  { %v2397_v42 = vsel %vm1231_vm7, %v1319_v41, %v1102_v39 }
 0x3f7   :  { %v1194_v44 = vpop.f32.mrf.mxu1 }
 0x3f8   :  { %v1195_v45 = vadd.f32 %v1494_v43, %v1194_v44 }
 0x3f9   :  { %v1877_v46 = vpop.f32.mrf.mxu1 }
 0x3fa   :  { %v2402_v47 = vmax.f32 %v1195_v45, 0.0 }
 0x3fc   :  { %v1210_v50 = vmul.f32 %v1205_v48, %v2402_v47  ;;  %v2408_v53 = vcombine.high %v2402_v47, %v2402_v47 }
 0x3fe   :  { %v1213_v56 = vsel %vm1212_vm8, %v1210_v50, 0.0  ;;  %v1211_v59 = vmul.f32 %v1209_v49, %v2408_v53 }
 0x3ff   :  { %1214 = vadd.xlane.f32.xlu0 %v1213_v56  ;;  %v1495_v56 = vld [vmem:[%s2480_s10] ss:$0 sm:$0xff] }
 0x400   :  { %v1216_v61 = vsel %vm1212_vm8, %v1211_v59, 0.0 }
 0x401   :  { %1217 = vadd.xlane.f32.xlu1 %v1216_v61 }
 0x488   :  { %v1215_v63 = vpop.xlane.xlu0 %1214 }
 0x489   :  { %v1226_v52 = vrot.slane %v1215_v63, %v1225_v62 }
 0x48a   :  { %v1218_v0 = vpop.xlane.xlu1 %1217 }
 0x48b   :  { %v1230_v5 = vrot.slane %v1218_v0, %v1225_v62 }
 0x48d   :  { %v1232_v7 = vsel %vm1231_vm7, %v1230_v5, %v1226_v52 }
 0x48e   :  { %v1235_v8 = vsel %vm1234_vm9, %v1232_v7, -inf }
 0x48f   :  { %1236 = vmax.xlane.f32.xlu1 %v1235_v8 }
 0x518   :  { %v1237_v9 = vpop.xlane.xlu1 %1236 }
 0x519   :  { %v1242_v11 = vrot.slane %v1237_v9, %v2376_v6  ;;  %v1246_v2 = vrot.slane %v1237_v9, %v2383_v10 }
 0x51b   :  { %v1249_v12 = vsub.f32 %v1215_v63, %v1242_v11  ;;  %v1250_v3 = vsub.f32 %v1218_v0, %v1246_v2 }
 0x51d   :  { %v1251_v13 = vmul.f32 1.442695, %v1249_v12  ;;  %v1253_v55 = vmul.f32 1.442695, %v1250_v3 }
 0x51f   :  { %1910 = vpow2.f32 %v1251_v13 }
 0x520   :  { %1912 = vpow2.f32 %v1253_v55 }
 0x52c   :  { %v1911_v14 = vpop.eup %1910 }
 0x52d   :  { %v1913_v15 = vpop.eup %1912  ;;  %1258 = vperm.xlu0 %1904, %v1911_v14  }
 0x52e   :  { %1261 = vperm.xlu1 %1905, %v1913_v15  }
 0x5a8   :  { %v1259_v16 = vpop.permute.xlu0 %1258 }
 0x5a9   :  { %v1262_v17 = vpop.permute.xlu1 %1261  ;;  %v1266_v57 = vrot.slane %v1259_v16, %v1225_v62 }
 0x5aa   :  { %v1270_v18 = vrot.slane %v1262_v17, %v1225_v62 }
 0x5ac   :  { %v1271_v19 = vsel %vm1231_vm7, %v1270_v18, %v1266_v57 }
 0x5ad   :  { %v1273_v20 = vsel %vm1234_vm9, %v1271_v19, 0.0 }
 0x5ae   :  { %1274 = vadd.xlane.f32.xlu1 %v1273_v20 }
 0x637   :  { %v1275_v21 = vpop.xlane.xlu1 %1274 }
 0x638   :  { %v1280_v22 = vrot.slane %v1275_v21, %v2376_v6  ;;  %v1284_v58 = vrot.slane %v1275_v21, %v2383_v10  ;;  %v1334_v6 = vld [vmem:[%s2479_s9 + $0x28] sm:$0xff]  ;;  %v1333_v10 = vld [vmem:[%s2479_s9 + $0x20] sm:$0xff] }
 0x639   :  { %1883 = vmatpush3.msra.mxu0 %v1334_v6 }
 0x63a   :  { %1914 = vrcp.f32 %v1280_v22  ;;  %1884 = vmatprep.subr.mxu0 %v1940_v4 }
 0x63b   :  { %1916 = vrcp.f32 %v1284_v58  ;;  %1885 = vmatpush3.msra.mxu0 %v1333_v10 }
 0x63c   :  { %1886 = vmatprep.subr.mxu0 %v1940_v4 }
 0x63d   :  { %1887 = vmatpush3.msra.mxu0 %v1332_v28 }
 0x63e   :  { %1888 = vmatprep.subr.mxu0 %v1940_v4 }
 0x63f   :  { %1889 = vmatpush3.msra.mxu0 %v1331_v29 }
 0x640   :  { %1890 = vmatprep.subr.mxu0 %v1940_v4 }
 0x641   :  { %1891 = vmatpush3.msra.mxu0 %v1330_v30 }
 0x642   :  { %1892 = vmatprep.subr.mxu0 %v1940_v4 }
 0x643   :  { %1893 = vmatpush3.msra.mxu0 %v1329_v40 }
 0x647   :  { %v1915_v23 = vpop.eup %1914 }
 0x648   :  { %v1288_v24 = vmul.f32 %v1915_v23, %v1911_v14  ;;  %v1917_v60 = vpop.eup %1916 }
 0x649   :  { %v1290_v25 = vmul.f32 %v1917_v60, %v1913_v15 }
 0x64a   :  { %1293 = vperm.xlu0 %1904, %v1288_v24  }
 0x64e   :  { %1298 = vperm.xlu0 %1904, %v1290_v25  }
 0x6c5   :  { %v1294_v31 = vpop.permute.xlu0 %1293 }
 0x6c6   :  { %v1301_v32 = vmul.f32 %v1294_v31, %v2402_v47 }
 0x6c8   :  { %v1303_v1 = vsel %vm1212_vm8, %v1301_v32, 0.0 }
 0x6c9   :  { %v1304_v33 = vrot.slane %v1303_v1, 4  ;;  %v1299_v34 = vpop.permute.xlu0 %1298 }
 0x6ca   :  { %v1302_v35 = vmul.f32 %v1299_v34, %v2408_v53 }
 0x6cb   :  { %v1305_v36 = vadd.f32 %v1304_v33, %v1303_v1 }
 0x6cc   :  { %v1310_v37 = vsel %vm1212_vm8, %v1302_v35, 0.0 }
 0x6cd   :  { %v1306_v38 = vrot.slane %v1305_v36, 2  ;;  %v1311_v39 = vrot.slane %v1310_v37, 4 }
 0x6cf   :  { %v1307_v4 = vadd.f32 %v1306_v38, %v1305_v36  ;;  %v1312_v41 = vadd.f32 %v1311_v39, %v1310_v37 }
 0x6d1   :  { %v1313_v43 = vrot.slane %v1312_v41, 2  ;;  %v1308_v44 = vrot.slane %v1307_v4, 1 }
 0x6d3   :  { %v1314_v45 = vadd.f32 %v1313_v43, %v1312_v41  ;;  %v1309_v47 = vadd.f32 %v1308_v44, %v1307_v4 }
 0x6d5   :  { %v1315_v46 = vrot.slane %v1314_v45, 1 }
 0x6d7   :  { %v1316_v48 = vadd.f32 %v1315_v46, %v1314_v45 }
 0x6d9   :  { %v1324_v50 = vsel %vm1231_vm7, %v1316_v48, %v1309_v47 }
 0x6da   :  { %1325 = vrot.lane.b32.xlu0 %v1324_v50, %s1942_s12 }
 0x74c   :  { %v1326_v53 = vpop.permute.xlu0 %1325 }
 0x74d   :  { %v1328_v49 = vsel %vm1053_vm4, %v2397_v42, %v1326_v53 }
 0x74e   :  { %1895 = vmatmul.mubr.msk.f32.vlgmr.msra.gmra.mxu0 %vm1055_vm5, %v1328_v49 }
 0x80e   :  { %v1413_v59 = vpop.f32.mrf.mxu0 }
 0x80f   :  { %v1414_v61 = vadd.f32 %v1495_v56, %v1413_v59 }
 0x810   :  { %v1896_v51 = vpop.f32.mrf.mxu0 }
 0x811   :  { %1418 = vst.msk [vmem:[#allocation3] sm:$0x3] %vm1417_vm10, %v1414_v61 }
 0x812   :  { %1929 = shalt.err (!%p1926_p4)
}
 0x813   :  { %1428 = dma.vmem_to_hbm [thread:$0]  %s1426_s13, 32, %s2481_s11, [#allocation4]  }
 0x814   :  { %1938 = dma.done.wait [#allocation4], 32  }
 0x815   :  { %1939 = vsyncadd [#allocation4], 4294967264 }
 0x816   :  { %1432 = vsyncpa [#allocation4], 1 }

</bundles_post_ra>
